<compile_context>
chip_gen: v7x
topology: tpu7x:2x2x1
jax: 0.10.0
libtpu: 0.0.40
codegen_flags: <defaults>
</compile_context>

<pallas_src>
from functools import partial

import jax
import jax.numpy as jnp
from jax.experimental import pallas as pl
from jax.experimental.pallas import tpu as pltpu

EPS = 1e-5  # PyTorch BatchNorm1d default eps

_NT_DIMS = (((1,), (1,)), ((), ()))  # contract last dim of both operands


def _choose_tl(L, c_max, B):
    """L-tile: multiple of 128 (256-multiples when tiled), as large as a
    conservative per-step VMEM activation budget allows (safe on v7x's 64 MiB
    / 32 MiB default scoped limit), keeping >= 2 grid steps for megacore."""
    budget = 8 * 1024 * 1024  # activation bytes per step, x2 double-buffering
    cap = 2048
    while cap > 256 and 3 * c_max * cap * 4 * 2 > budget:
        cap //= 2
    l128 = -(-L // 128) * 128
    tl = min(l128, cap)
    if B * (-(-L // tl)) < 2 and tl > 256:
        half = -(-l128 // 2)
        tl = max(256, -(-half // 256) * 256)
    return tl


def _lane_partial_sums(v):
    """Sum v (R, TL) over L via ones(8,TL) @ v^T on the MXU.  Result (8, R) is
    already lane-major (channels on lanes), so the store is one vreg per stat
    instead of R/8 masked last-dim-1 stores.  Rows are identical; row 0 is used."""
    ones = jnp.ones((8, v.shape[-1]), jnp.float32)
    return jax.lax.dot_general(ones, v, _NT_DIMS,
                               preferred_element_type=jnp.float32)


# ----------------------------------------------------------------------------
# Kernel 1: per-channel partial sum / sum-of-squares of x over one (b, L-tile)
# block.  Each step writes its own partial block -> fully parallel grid.
# (x is zero-padded along L, so padded columns contribute 0 to both sums.)
# ----------------------------------------------------------------------------
def _stats_kernel(x_ref, sum_ref, sumsq_ref):
    xv = x_ref[0]                              # (C, TL) f32
    sum_ref[0] = _lane_partial_sums(xv)        # (8, C) lane-dense
    sumsq_ref[0] = _lane_partial_sums(xv * xv)


def channel_stats(x, tl, true_len):
    """x: (B, C, L_pad) zero-padded -> (mean, inv_std), each shape (C,)."""
    B, C, Lp = x.shape
    nL = Lp // tl
    sums, sumsqs = pl.pallas_call(
        _stats_kernel,
        out_shape=(jax.ShapeDtypeStruct((B * nL, 8, C), jnp.float32),
                   jax.ShapeDtypeStruct((B * nL, 8, C), jnp.float32)),
        grid=(B, nL),
        in_specs=[pl.BlockSpec((1, C, tl), lambda b, l: (b, 0, l))],
        out_specs=(pl.BlockSpec((1, 8, C), lambda b, l: (b * nL + l, 0, 0)),
                   pl.BlockSpec((1, 8, C), lambda b, l: (b * nL + l, 0, 0))),
        compiler_params=pltpu.CompilerParams(
            dimension_semantics=("parallel", "parallel")),
    )(x)
    n = float(B * true_len)
    mean = jnp.sum(sums[:, 0, :], axis=0) / n                  # (C,)
    var = jnp.sum(sumsqs[:, 0, :], axis=0) / n - mean * mean   # biased var
    return mean, jax.lax.rsqrt(var + EPS)


# ----------------------------------------------------------------------------
# gamma/beta projections + BN folding, done once per call in the wrapper:
#   cbn(v) = gamma * (v - mean) * istd + beta = g_eff * v + b_eff
# ----------------------------------------------------------------------------
def _affine_coeffs(c, wg, bg, wb, bb, mean, istd):
    C = wg.shape[0]
    w_cat = jnp.concatenate([wg, wb], axis=0)   # (2C, Cd)
    b_cat = jnp.concatenate([bg, bb], axis=0)   # (2C,)
    gb = c @ w_cat.T + b_cat                    # one (B,Cd)@(Cd,2C) matmul
    gamma, beta = gb[:, :C], gb[:, C:]
    g_eff = gamma * istd[None, :]               # (B, C)
    b_eff = beta - g_eff * mean[None, :]        # (B, C)
    return g_eff[:, :, None], b_eff[:, :, None]  # (B, C, 1)


# ----------------------------------------------------------------------------
# Kernel 2: net = fc_0(relu(g_eff * x + b_eff)) fused (bf16 MXU operands),
# plus lane-dense partial sum / sum-of-squares of net for bn_1.  Statistics
# are taken from the bf16-rounded `net` (what kernel 3 normalizes) and padded
# columns are masked out.
# ----------------------------------------------------------------------------
def _bn_relu_fc_stats_kernel(x_ref, g_ref, bt_ref, w_ref, b_ref,
                             net_ref, sum_ref, sumsq_ref, *, true_len, tile_l):
    xv = x_ref[0]                                           # (Cin, TL) f32
    h = jnp.maximum(g_ref[0] * xv + bt_ref[0], 0.0)         # fused CBN + ReLU
    net = jnp.dot(w_ref[...], h.astype(w_ref.dtype),        # bf16 MXU, f32 acc
                  preferred_element_type=jnp.float32) + b_ref[...]
    net_r = net.astype(net_ref.dtype)
    net_ref[0] = net_r                                      # bf16 store (HBM /2)
    src = net_r.astype(jnp.float32)
    if true_len % tile_l != 0:                              # mask padded columns
        col = (pl.program_id(1) * tile_l
               + jax.lax.broadcasted_iota(jnp.int32, (1, tile_l), 1))
        src = jnp.where(col < true_len, src, 0.0)
    sum_ref[0] = _lane_partial_sums(src)
    sumsq_ref[0] = _lane_partial_sums(src * src)


def cbn_relu_fc(x, g_eff, b_eff, w_bf16, bias, tl, true_len,
                net_dtype=jnp.bfloat16):
    B, Cin, Lp = x.shape
    H = w_bf16.shape[0]
    nL = Lp // tl
    fixed = lambda shp: pl.BlockSpec(shp, lambda b, l: (0, 0))
    kern = partial(_bn_relu_fc_stats_kernel, true_len=true_len, tile_l=tl)
    return pl.pallas_call(
        kern,
        out_shape=(jax.ShapeDtypeStruct((B, H, Lp), net_dtype),
                   jax.ShapeDtypeStruct((B * nL, 8, H), jnp.float32),
                   jax.ShapeDtypeStruct((B * nL, 8, H), jnp.float32)),
        grid=(B, nL),
        in_specs=[
            pl.BlockSpec((1, Cin, tl), lambda b, l: (b, 0, l)),
            pl.BlockSpec((1, Cin, 1), lambda b, l: (b, 0, 0)),
            pl.BlockSpec((1, Cin, 1), lambda b, l: (b, 0, 0)),
            fixed((H, Cin)), fixed((H, 1)),
        ],
        out_specs=(pl.BlockSpec((1, H, tl), lambda b, l: (b, 0, l)),
                   pl.BlockSpec((1, 8, H), lambda b, l: (b * nL + l, 0, 0)),
                   pl.BlockSpec((1, 8, H), lambda b, l: (b * nL + l, 0, 0))),
        compiler_params=pltpu.CompilerParams(
            dimension_semantics=("parallel", "parallel")),
    )(x, g_eff, b_eff, w_bf16, bias)


# ----------------------------------------------------------------------------
# Kernel 3: out = shortcut(x) + fc_1(relu(g_eff * net + b_eff)).
#   * conv shortcut:   single wider-K matmul  [w1 | ws] @ [h ; x]
#   * identity shortcut: w1 @ h  +  x   (plain VPU add, no eye-matmul)
# ----------------------------------------------------------------------------
def _bn_relu_fc_add_kernel(net_ref, x_ref, g_ref, bt_ref, wcat_ref, b1_ref,
                           out_ref, *, identity_shortcut):
    nv = net_ref[0].astype(jnp.float32)                     # (H, TL)
    xv = x_ref[0]                                           # (Cin, TL) f32
    h = jnp.maximum(g_ref[0] * nv + bt_ref[0], 0.0)         # fused CBN + ReLU
    hb = h.astype(wcat_ref.dtype)                           # bf16 for the MXU
    if identity_shortcut:
        dx = jnp.dot(wcat_ref[...], hb, preferred_element_type=jnp.float32)
        out_ref[0] = dx + xv + b1_ref[...]
    else:
        hcat = jnp.concatenate([hb, xv.astype(wcat_ref.dtype)], axis=0)
        out_ref[0] = jnp.dot(wcat_ref[...], hcat,
                             preferred_element_type=jnp.float32) + b1_ref[...]


def cbn_relu_fc_add(net, x, g_eff, b_eff, wcat_bf16, b1, tl, identity_shortcut):
    B, H, Lp = net.shape
    Cin = x.shape[1]
    Cout, K = wcat_bf16.shape
    nL = Lp // tl
    fixed = lambda shp: pl.BlockSpec(shp, lambda b, l: (0, 0))
    kern = partial(_bn_relu_fc_add_kernel, identity_shortcut=identity_shortcut)
    return pl.pallas_call(
        kern,
        out_shape=jax.ShapeDtypeStruct((B, Cout, Lp), jnp.float32),
        grid=(B, nL),
        in_specs=[
            pl.BlockSpec((1, H, tl), lambda b, l: (b, 0, l)),
            pl.BlockSpec((1, Cin, tl), lambda b, l: (b, 0, l)),
            pl.BlockSpec((1, H, 1), lambda b, l: (b, 0, 0)),
            pl.BlockSpec((1, H, 1), lambda b, l: (b, 0, 0)),
            fixed((Cout, K)), fixed((Cout, 1)),
        ],
        out_specs=pl.BlockSpec((1, Cout, tl), lambda b, l: (b, 0, l)),
        compiler_params=pltpu.CompilerParams(
            dimension_semantics=("parallel", "parallel")),
    )(net, x, g_eff, b_eff, wcat_bf16, b1)


# ----------------------------------------------------------------------------
# Full block forward.  x: (B, size_in, L) (PyTorch NCL), c: (B, c_dim).
# ----------------------------------------------------------------------------
@jax.jit
def cresnet_block_conv1d(x, c, p):
    B, Cin, L = x.shape
    H = p["w0"].shape[0]
    Cout = p["w1"].shape[0]
    tl = _choose_tl(L, max(Cin, H, Cout), B)
    nL = -(-L // tl)
    Lp = nL * tl
    xp = x if Lp == L else jnp.pad(x, ((0, 0), (0, 0), (0, Lp - L)))

    bf16 = jnp.bfloat16
    w0 = p["w0"].astype(bf16)
    identity = p.get("ws") is None
    if identity:
        wcat = p["w1"].astype(bf16)        # shortcut handled as a plain add
    else:
        wcat = jnp.concatenate([p["w1"], p["ws"]], axis=1).astype(bf16)

    # bn_0 batch statistics (Pallas partial reduction) + folded gamma/beta.
    mean0, istd0 = channel_stats(xp, tl, L)
    g0, bt0 = _affine_coeffs(c, p["wg0"], p["bg0"], p["wb0"], p["bb0"],
                             mean0, istd0)

    # net = fc_0(relu(cbn_0(x, c))) + bn_1 partial statistics in the same pass.
    net, sum1, sumsq1 = cbn_relu_fc(xp, g0, bt0, w0, p["b0"][:, None], tl, L)

    n = float(B * L)
    mean1 = jnp.sum(sum1[:, 0, :], axis=0) / n
    var1 = jnp.sum(sumsq1[:, 0, :], axis=0) / n - mean1 * mean1
    istd1 = jax.lax.rsqrt(var1 + EPS)
    g1, bt1 = _affine_coeffs(c, p["wg1"], p["bg1"], p["wb1"], p["bb1"],
                             mean1, istd1)

    # out = shortcut(x) + fc_1(relu(cbn_1(net, c)))
    out = cbn_relu_fc_add(net, xp, g1, bt1, wcat, p["b1"][:, None], tl, identity)
    return out if Lp == L else out[:, :, :L]


# ----------------------------------------------------------------------------
# Pure-JAX f32 reference (same semantics, NCL layout) for verification.
# ----------------------------------------------------------------------------
def reference(x, c, p):
    def cbn(v, wg, bg, wb, bb):
        mean = jnp.mean(v, axis=(0, 2), keepdims=True)
        var = jnp.mean(v * v, axis=(0, 2), keepdims=True) - mean * mean
        vn = (v - mean) / jnp.sqrt(var + EPS)
        gamma = (c @ wg.T + bg)[:, :, None]
        beta = (c @ wb.T + bb)[:, :, None]
        return gamma * vn + beta

    def conv1x1(v, w, b=None):
        y = jnp.einsum("oc,bcl->bol", w, v, precision="highest")
        return y if b is None else y + b[None, :, None]

    h0 = jax.nn.relu(cbn(x, p["wg0"], p["bg0"], p["wb0"], p["bb0"]))
    net = conv1x1(h0, p["w0"], p["b0"])
    h1 = jax.nn.relu(cbn(net, p["wg1"], p["bg1"], p["wb1"], p["bb1"]))
    dx = conv1x1(h1, p["w1"], p["b1"])
    xs = x if p.get("ws") is None else conv1x1(x, p["ws"])
    return xs + dx


def _make_params(key, c_dim, size_in, size_h, size_out, scale=0.1):
    ks = jax.random.split(key, 15)
    f32 = jnp.float32
    rnd = lambda k, shp: jax.random.normal(k, shp, f32) * scale
    # Shortcut conv only when size_in != size_out (identity otherwise).
    ws = None if size_in == size_out else rnd(ks[14], (size_out, size_in))
    return {
        "wg0": rnd(ks[0], (size_in, c_dim)), "bg0": rnd(ks[1], (size_in,)),
        "wb0": rnd(ks[2], (size_in, c_dim)), "bb0": rnd(ks[3], (size_in,)),
        "w0": rnd(ks[4], (size_h, size_in)), "b0": rnd(ks[5], (size_h,)),
        "wg1": rnd(ks[6], (size_h, c_dim)), "bg1": rnd(ks[7], (size_h,)),
        "wb1": rnd(ks[8], (size_h, c_dim)), "bb1": rnd(ks[9], (size_h,)),
        "w1": rnd(ks[10], (size_out, size_h)), "b1": rnd(ks[11], (size_out,)),
        "ws": ws,
    }


if __name__ == "__main__":
    key = jax.random.PRNGKey(0)
    k1, k2, k3, k4, k5, k6 = jax.random.split(key, 6)
    f32 = jnp.float32

    # Config A: conv shortcut (size_in != size_out), unaligned L (padding path).
    B, L, c_dim, size_in, size_h, size_out = 4, 200, 16, 32, 64, 48
    x = jax.random.normal(k1, (B, size_in, L), f32)    # PyTorch NCL layout
    c = jax.random.normal(k2, (B, c_dim), f32)
    params = _make_params(k3, c_dim, size_in, size_h, size_out)
    out = jax.block_until_ready(cresnet_block_conv1d(x, c, params))
    ref = reference(x, c, params)
    assert out.shape == (B, size_out, L), out.shape
    err = float(jnp.max(jnp.abs(out - ref)))
    # Tolerance covers bf16 MXU operands and the bf16 `net` intermediate.
    assert jnp.allclose(out, ref, atol=3e-2, rtol=3e-2), err

    # Config B: identity shortcut (size_in == size_out), aligned L.
    B2, L2, c_dim2, size_in2, size_h2, size_out2 = 2, 512, 8, 32, 48, 32
    x2 = jax.random.normal(k4, (B2, size_in2, L2), f32)
    c2 = jax.random.normal(k5, (B2, c_dim2), f32)
    params2 = _make_params(k6, c_dim2, size_in2, size_h2, size_out2)
    out2 = jax.block_until_ready(cresnet_block_conv1d(x2, c2, params2))
    ref2 = reference(x2, c2, params2)
    assert out2.shape == (B2, size_out2, L2), out2.shape
    err2 = float(jnp.max(jnp.abs(out2 - ref2)))
    assert jnp.allclose(out2, ref2, atol=3e-2, rtol=3e-2), err2

    print("KERNEL_OK")
</pallas_src>

<mosaic_0001>
module attributes {stable_mosaic.version = 11 : i64} {
  func.func @_stats_kernel(%arg0: i32, %arg1: i32, %arg2: memref<1x32x256xf32, #tpu.memory_space<vmem>>, %arg3: memref<1x8x32xf32, #tpu.memory_space<vmem>>, %arg4: memref<1x8x32xf32, #tpu.memory_space<vmem>>) attributes {dimension_semantics = [#tpu.dimension_semantics<parallel>, #tpu.dimension_semantics<parallel>], iteration_bounds = array<i64: 4, 1>, scalar_prefetch = 0 : i64, scratch_operands = 0 : i64, tpu.core_type = #tpu.core_type<tc>, window_params = [{transform_indices = @transform_0, window_bounds = array<i64: 1, 32, 256>}, {transform_indices = @transform_1, window_bounds = array<i64: 1, 8, 32>}, {transform_indices = @transform_2, window_bounds = array<i64: 1, 8, 32>}]} {
    %c0 = arith.constant 0 : index
    %c0_0 = arith.constant 0 : index
    %c0_1 = arith.constant 0 : index
    %0 = vector.load %arg2[%c0, %c0_0, %c0_1] : memref<1x32x256xf32, #tpu.memory_space<vmem>>, vector<1x32x256xf32>
    %1 = vector.shape_cast %0 : vector<1x32x256xf32> to vector<32x256xf32>
    %cst = arith.constant 1.000000e+00 : f32
    %2 = vector.broadcast %cst : f32 to vector<8x256xf32>
    %cst_2 = arith.constant dense<0.000000e+00> : vector<8x32xf32>
    %3 = tpu.matmul %2, %1, %cst_2 {dimension_numbers = #tpu.dot_dimension_numbers<[1], [1], [0], [0], [0, 0, 1, 0], [], []>} : vector<8x256xf32>, vector<32x256xf32>, vector<8x32xf32> -> vector<8x32xf32>
    %c0_3 = arith.constant 0 : index
    %c0_4 = arith.constant 0 : index
    %c0_5 = arith.constant 0 : index
    %4 = vector.load %arg3[%c0_3, %c0_4, %c0_5] : memref<1x8x32xf32, #tpu.memory_space<vmem>>, vector<1x8x32xf32>
    %5 = vector.shape_cast %4 : vector<1x8x32xf32> to vector<8x32xf32>
    %6 = vector.shape_cast %3 : vector<8x32xf32> to vector<1x8x32xf32>
    tpu.vector_store %arg3[%c0_3, %c0_4, %c0_5], %6 {strides = array<i32>} : memref<1x8x32xf32, #tpu.memory_space<vmem>>, vector<1x8x32xf32>,
    %7 = arith.mulf %1, %1 : vector<32x256xf32>
    %cst_6 = arith.constant 1.000000e+00 : f32
    %8 = vector.broadcast %cst_6 : f32 to vector<8x256xf32>
    %cst_7 = arith.constant dense<0.000000e+00> : vector<8x32xf32>
    %9 = tpu.matmul %8, %7, %cst_7 {dimension_numbers = #tpu.dot_dimension_numbers<[1], [1], [0], [0], [0, 0, 1, 0], [], []>} : vector<8x256xf32>, vector<32x256xf32>, vector<8x32xf32> -> vector<8x32xf32>
    %c0_8 = arith.constant 0 : index
    %c0_9 = arith.constant 0 : index
    %c0_10 = arith.constant 0 : index
    %10 = vector.load %arg4[%c0_8, %c0_9, %c0_10] : memref<1x8x32xf32, #tpu.memory_space<vmem>>, vector<1x8x32xf32>
    %11 = vector.shape_cast %10 : vector<1x8x32xf32> to vector<8x32xf32>
    %12 = vector.shape_cast %9 : vector<8x32xf32> to vector<1x8x32xf32>
    tpu.vector_store %arg4[%c0_8, %c0_9, %c0_10], %12 {strides = array<i32>} : memref<1x8x32xf32, #tpu.memory_space<vmem>>, vector<1x8x32xf32>,
    return
  }
  func.func @transform_0(%arg0: i32, %arg1: i32) -> (i32, i32, i32) {
    %c0_i32 = arith.constant 0 : i32
    %c0_i32_0 = arith.constant 0 : i32
    return %arg0, %c0_i32, %arg1 : i32, i32, i32
  }
  func.func @transform_1(%arg0: i32, %arg1: i32) -> (i32, i32, i32) {
    %c1_i32 = arith.constant 1 : i32
    %0 = arith.muli %arg0, %c1_i32 : i32
    %1 = arith.addi %0, %arg1 : i32
    %c0_i32 = arith.constant 0 : i32
    %c0_i32_0 = arith.constant 0 : i32
    %c0_i32_1 = arith.constant 0 : i32
    return %1, %c0_i32, %c0_i32_0 : i32, i32, i32
  }
  func.func @transform_2(%arg0: i32, %arg1: i32) -> (i32, i32, i32) {
    %c1_i32 = arith.constant 1 : i32
    %0 = arith.muli %arg0, %c1_i32 : i32
    %1 = arith.addi %0, %arg1 : i32
    %c0_i32 = arith.constant 0 : i32
    %c0_i32_0 = arith.constant 0 : i32
    %c0_i32_1 = arith.constant 0 : i32
    return %1, %c0_i32, %c0_i32_0 : i32, i32, i32
  }
}

module attributes {stable_mosaic.version = 11 : i64} {
  func.func @_bn_relu_fc_stats_kernel(%arg0: i32, %arg1: i32, %arg2: memref<1x32x256xf32, #tpu.memory_space<vmem>>, %arg3: memref<1x32x1xf32, #tpu.memory_space<vmem>>, %arg4: memref<1x32x1xf32, #tpu.memory_space<vmem>>, %arg5: memref<64x32xbf16, #tpu.memory_space<vmem>>, %arg6: memref<64x1xf32, #tpu.memory_space<vmem>>, %arg7: memref<1x64x256xbf16, #tpu.memory_space<vmem>>, %arg8: memref<1x8x64xf32, #tpu.memory_space<vmem>>, %arg9: memref<1x8x64xf32, #tpu.memory_space<vmem>>) attributes {dimension_semantics = [#tpu.dimension_semantics<parallel>, #tpu.dimension_semantics<parallel>], iteration_bounds = array<i64: 4, 1>, scalar_prefetch = 0 : i64, scratch_operands = 0 : i64, tpu.core_type = #tpu.core_type<tc>, window_params = [{transform_indices = @transform_0, window_bounds = array<i64: 1, 32, 256>}, {transform_indices = @transform_1, window_bounds = array<i64: 1, 32, 1>}, {transform_indices = @transform_2, window_bounds = array<i64: 1, 32, 1>}, {pipeline_mode = #tpu.pipeline_mode<synchronous>, transform_indices = @transform_3, window_bounds = array<i64: 64, 32>}, {pipeline_mode = #tpu.pipeline_mode<synchronous>, transform_indices = @transform_4, window_bounds = array<i64: 64, 1>}, {transform_indices = @transform_5, window_bounds = array<i64: 1, 64, 256>}, {transform_indices = @transform_6, window_bounds = array<i64: 1, 8, 64>}, {transform_indices = @transform_7, window_bounds = array<i64: 1, 8, 64>}]} {
    %c0 = arith.constant 0 : index
    %c0_0 = arith.constant 0 : index
    %c0_1 = arith.constant 0 : index
    %0 = vector.load %arg2[%c0, %c0_0, %c0_1] : memref<1x32x256xf32, #tpu.memory_space<vmem>>, vector<1x32x256xf32>
    %1 = vector.shape_cast %0 : vector<1x32x256xf32> to vector<32x256xf32>
    %c0_2 = arith.constant 0 : index
    %c0_3 = arith.constant 0 : index
    %c0_4 = arith.constant 0 : index
    %2 = vector.load %arg3[%c0_2, %c0_3, %c0_4] : memref<1x32x1xf32, #tpu.memory_space<vmem>>, vector<1x32x1xf32>
    %3 = vector.shape_cast %2 : vector<1x32x1xf32> to vector<32x1xf32>
    %4 = vector.broadcast %3 : vector<32x1xf32> to vector<32x256xf32>
    %5 = arith.mulf %4, %1 : vector<32x256xf32>
    %c0_5 = arith.constant 0 : index
    %c0_6 = arith.constant 0 : index
    %c0_7 = arith.constant 0 : index
    %6 = vector.load %arg4[%c0_5, %c0_6, %c0_7] : memref<1x32x1xf32, #tpu.memory_space<vmem>>, vector<1x32x1xf32>
    %7 = vector.shape_cast %6 : vector<1x32x1xf32> to vector<32x1xf32>
    %8 = vector.broadcast %7 : vector<32x1xf32> to vector<32x256xf32>
    %9 = arith.addf %5, %8 : vector<32x256xf32>
    %cst = arith.constant 0.000000e+00 : f32
    %10 = vector.broadcast %cst : f32 to vector<32x256xf32>
    %11 = arith.maximumf %9, %10 : vector<32x256xf32>
    %c0_8 = arith.constant 0 : index
    %c0_9 = arith.constant 0 : index
    %12 = vector.load %arg5[%c0_8, %c0_9] : memref<64x32xbf16, #tpu.memory_space<vmem>>, vector<64x32xbf16>
    %13 = arith.truncf %11 : vector<32x256xf32> to vector<32x256xbf16>
    %cst_10 = arith.constant dense<0.000000e+00> : vector<64x256xf32>
    %14 = tpu.matmul %12, %13, %cst_10 {dimension_numbers = #tpu.dot_dimension_numbers<[1], [0], [0], [1], [0, 0, 1, 1], [], []>} : vector<64x32xbf16>, vector<32x256xbf16>, vector<64x256xf32> -> vector<64x256xf32>
    %c0_11 = arith.constant 0 : index
    %c0_12 = arith.constant 0 : index
    %15 = vector.load %arg6[%c0_11, %c0_12] : memref<64x1xf32, #tpu.memory_space<vmem>>, vector<64x1xf32>
    %16 = vector.broadcast %15 : vector<64x1xf32> to vector<64x256xf32>
    %17 = arith.addf %14, %16 : vector<64x256xf32>
    %18 = arith.truncf %17 : vector<64x256xf32> to vector<64x256xbf16>
    %c0_13 = arith.constant 0 : index
    %c0_14 = arith.constant 0 : index
    %c0_15 = arith.constant 0 : index
    %19 = vector.load %arg7[%c0_13, %c0_14, %c0_15] : memref<1x64x256xbf16, #tpu.memory_space<vmem>>, vector<1x64x256xbf16>
    %20 = vector.shape_cast %19 : vector<1x64x256xbf16> to vector<64x256xbf16>
    %21 = vector.shape_cast %18 : vector<64x256xbf16> to vector<1x64x256xbf16>
    tpu.vector_store %arg7[%c0_13, %c0_14, %c0_15], %21 {strides = array<i32>} : memref<1x64x256xbf16, #tpu.memory_space<vmem>>, vector<1x64x256xbf16>,
    %22 = arith.extf %18 : vector<64x256xbf16> to vector<64x256xf32>
    %c256_i32 = arith.constant 256 : i32
    %23 = arith.muli %arg1, %c256_i32 : i32
    %24 = tpu.iota {dimensions = array<i32: 1>} : vector<1x256xi32>
    %25 = vector.broadcast %23 : i32 to vector<1x256xi32>
    %26 = arith.addi %25, %24 : vector<1x256xi32>
    %c200_i32 = arith.constant 200 : i32
    %27 = vector.broadcast %c200_i32 : i32 to vector<1x256xi32>
    %28 = arith.cmpi slt, %26, %27 : vector<1x256xi32>
    %cst_16 = arith.constant 0.000000e+00 : f32
    %29 = vector.shape_cast %28 : vector<1x256xi1> to vector<1x256xi1>
    %30 = vector.broadcast %29 : vector<1x256xi1> to vector<64x256xi1>
    %31 = vector.broadcast %cst_16 : f32 to vector<64x256xf32>
    %32 = arith.select %30, %22, %31 : vector<64x256xi1>, vector<64x256xf32>
    %cst_17 = arith.constant 1.000000e+00 : f32
    %33 = vector.broadcast %cst_17 : f32 to vector<8x256xf32>
    %cst_18 = arith.constant dense<0.000000e+00> : vector<8x64xf32>
    %34 = tpu.matmul %33, %32, %cst_18 {dimension_numbers = #tpu.dot_dimension_numbers<[1], [1], [0], [0], [0, 0, 1, 0], [], []>} : vector<8x256xf32>, vector<64x256xf32>, vector<8x64xf32> -> vector<8x64xf32>
    %c0_19 = arith.constant 0 : index
    %c0_20 = arith.constant 0 : index
    %c0_21 = arith.constant 0 : index
    %35 = vector.load %arg8[%c0_19, %c0_20, %c0_21] : memref<1x8x64xf32, #tpu.memory_space<vmem>>, vector<1x8x64xf32>
    %36 = vector.shape_cast %35 : vector<1x8x64xf32> to vector<8x64xf32>
    %37 = vector.shape_cast %34 : vector<8x64xf32> to vector<1x8x64xf32>
    tpu.vector_store %arg8[%c0_19, %c0_20, %c0_21], %37 {strides = array<i32>} : memref<1x8x64xf32, #tpu.memory_space<vmem>>, vector<1x8x64xf32>,
    %38 = arith.mulf %32, %32 : vector<64x256xf32>
    %cst_22 = arith.constant 1.000000e+00 : f32
    %39 = vector.broadcast %cst_22 : f32 to vector<8x256xf32>
    %cst_23 = arith.constant dense<0.000000e+00> : vector<8x64xf32>
    %40 = tpu.matmul %39, %38, %cst_23 {dimension_numbers = #tpu.dot_dimension_numbers<[1], [1], [0], [0], [0, 0, 1, 0], [], []>} : vector<8x256xf32>, vector<64x256xf32>, vector<8x64xf32> -> vector<8x64xf32>
    %c0_24 = arith.constant 0 : index
    %c0_25 = arith.constant 0 : index
    %c0_26 = arith.constant 0 : index
    %41 = vector.load %arg9[%c0_24, %c0_25, %c0_26] : memref<1x8x64xf32, #tpu.memory_space<vmem>>, vector<1x8x64xf32>
    %42 = vector.shape_cast %41 : vector<1x8x64xf32> to vector<8x64xf32>
    %43 = vector.shape_cast %40 : vector<8x64xf32> to vector<1x8x64xf32>
    tpu.vector_store %arg9[%c0_24, %c0_25, %c0_26], %43 {strides = array<i32>} : memref<1x8x64xf32, #tpu.memory_space<vmem>>, vector<1x8x64xf32>,
    return
  }
  func.func @transform_0(%arg0: i32, %arg1: i32) -> (i32, i32, i32) {
    %c0_i32 = arith.constant 0 : i32
    %c0_i32_0 = arith.constant 0 : i32
    return %arg0, %c0_i32, %arg1 : i32, i32, i32
  }
  func.func @transform_1(%arg0: i32, %arg1: i32) -> (i32, i32, i32) {
    %c0_i32 = arith.constant 0 : i32
    %c0_i32_0 = arith.constant 0 : i32
    %c0_i32_1 = arith.constant 0 : i32
    return %arg0, %c0_i32, %c0_i32_0 : i32, i32, i32
  }
  func.func @transform_2(%arg0: i32, %arg1: i32) -> (i32, i32, i32) {
    %c0_i32 = arith.constant 0 : i32
    %c0_i32_0 = arith.constant 0 : i32
    %c0_i32_1 = arith.constant 0 : i32
    return %arg0, %c0_i32, %c0_i32_0 : i32, i32, i32
  }
  func.func @transform_3(%arg0: i32, %arg1: i32) -> (i32, i32) {
    %c0_i32 = arith.constant 0 : i32
    %c0_i32_0 = arith.constant 0 : i32
    %c0_i32_1 = arith.constant 0 : i32
    return %c0_i32, %c0_i32_0 : i32, i32
  }
  func.func @transform_4(%arg0: i32, %arg1: i32) -> (i32, i32) {
    %c0_i32 = arith.constant 0 : i32
    %c0_i32_0 = arith.constant 0 : i32
    %c0_i32_1 = arith.constant 0 : i32
    return %c0_i32, %c0_i32_0 : i32, i32
  }
  func.func @transform_5(%arg0: i32, %arg1: i32) -> (i32, i32, i32) {
    %c0_i32 = arith.constant 0 : i32
    %c0_i32_0 = arith.constant 0 : i32
    return %arg0, %c0_i32, %arg1 : i32, i32, i32
  }
  func.func @transform_6(%arg0: i32, %arg1: i32) -> (i32, i32, i32) {
    %c1_i32 = arith.constant 1 : i32
    %0 = arith.muli %arg0, %c1_i32 : i32
    %1 = arith.addi %0, %arg1 : i32
    %c0_i32 = arith.constant 0 : i32
    %c0_i32_0 = arith.constant 0 : i32
    %c0_i32_1 = arith.constant 0 : i32
    return %1, %c0_i32, %c0_i32_0 : i32, i32, i32
  }
  func.func @transform_7(%arg0: i32, %arg1: i32) -> (i32, i32, i32) {
    %c1_i32 = arith.constant 1 : i32
    %0 = arith.muli %arg0, %c1_i32 : i32
    %1 = arith.addi %0, %arg1 : i32
    %c0_i32 = arith.constant 0 : i32
    %c0_i32_0 = arith.constant 0 : i32
    %c0_i32_1 = arith.constant 0 : i32
    return %1, %c0_i32, %c0_i32_0 : i32, i32, i32
  }
}

module attributes {stable_mosaic.version = 11 : i64} {
  func.func @_bn_relu_fc_add_kernel(%arg0: i32, %arg1: i32, %arg2: memref<1x64x256xbf16, #tpu.memory_space<vmem>>, %arg3: memref<1x32x256xf32, #tpu.memory_space<vmem>>, %arg4: memref<1x64x1xf32, #tpu.memory_space<vmem>>, %arg5: memref<1x64x1xf32, #tpu.memory_space<vmem>>, %arg6: memref<48x96xbf16, #tpu.memory_space<vmem>>, %arg7: memref<48x1xf32, #tpu.memory_space<vmem>>, %arg8: memref<1x48x256xf32, #tpu.memory_space<vmem>>) attributes {dimension_semantics = [#tpu.dimension_semantics<parallel>, #tpu.dimension_semantics<parallel>], iteration_bounds = array<i64: 4, 1>, scalar_prefetch = 0 : i64, scratch_operands = 0 : i64, tpu.core_type = #tpu.core_type<tc>, window_params = [{transform_indices = @transform_0, window_bounds = array<i64: 1, 64, 256>}, {transform_indices = @transform_1, window_bounds = array<i64: 1, 32, 256>}, {transform_indices = @transform_2, window_bounds = array<i64: 1, 64, 1>}, {transform_indices = @transform_3, window_bounds = array<i64: 1, 64, 1>}, {pipeline_mode = #tpu.pipeline_mode<synchronous>, transform_indices = @transform_4, window_bounds = array<i64: 48, 96>}, {pipeline_mode = #tpu.pipeline_mode<synchronous>, transform_indices = @transform_5, window_bounds = array<i64: 48, 1>}, {transform_indices = @transform_6, window_bounds = array<i64: 1, 48, 256>}]} {
    %c0 = arith.constant 0 : index
    %c0_0 = arith.constant 0 : index
    %c0_1 = arith.constant 0 : index
    %0 = vector.load %arg2[%c0, %c0_0, %c0_1] : memref<1x64x256xbf16, #tpu.memory_space<vmem>>, vector<1x64x256xbf16>
    %1 = vector.shape_cast %0 : vector<1x64x256xbf16> to vector<64x256xbf16>
    %2 = arith.extf %1 : vector<64x256xbf16> to vector<64x256xf32>
    %c0_2 = arith.constant 0 : index
    %c0_3 = arith.constant 0 : index
    %c0_4 = arith.constant 0 : index
    %3 = vector.load %arg3[%c0_2, %c0_3, %c0_4] : memref<1x32x256xf32, #tpu.memory_space<vmem>>, vector<1x32x256xf32>
    %4 = vector.shape_cast %3 : vector<1x32x256xf32> to vector<32x256xf32>
    %c0_5 = arith.constant 0 : index
    %c0_6 = arith.constant 0 : index
    %c0_7 = arith.constant 0 : index
    %5 = vector.load %arg4[%c0_5, %c0_6, %c0_7] : memref<1x64x1xf32, #tpu.memory_space<vmem>>, vector<1x64x1xf32>
    %6 = vector.shape_cast %5 : vector<1x64x1xf32> to vector<64x1xf32>
    %7 = vector.broadcast %6 : vector<64x1xf32> to vector<64x256xf32>
    %8 = arith.mulf %7, %2 : vector<64x256xf32>
    %c0_8 = arith.constant 0 : index
    %c0_9 = arith.constant 0 : index
    %c0_10 = arith.constant 0 : index
    %9 = vector.load %arg5[%c0_8, %c0_9, %c0_10] : memref<1x64x1xf32, #tpu.memory_space<vmem>>, vector<1x64x1xf32>
    %10 = vector.shape_cast %9 : vector<1x64x1xf32> to vector<64x1xf32>
    %11 = vector.broadcast %10 : vector<64x1xf32> to vector<64x256xf32>
    %12 = arith.addf %8, %11 : vector<64x256xf32>
    %cst = arith.constant 0.000000e+00 : f32
    %13 = vector.broadcast %cst : f32 to vector<64x256xf32>
    %14 = arith.maximumf %12, %13 : vector<64x256xf32>
    %15 = arith.truncf %14 : vector<64x256xf32> to vector<64x256xbf16>
    %16 = arith.truncf %4 : vector<32x256xf32> to vector<32x256xbf16>
    %17 = tpu.concatenate %15, %16 in 0 : vector<64x256xbf16>, vector<32x256xbf16> -> vector<96x256xbf16>
    %c0_11 = arith.constant 0 : index
    %c0_12 = arith.constant 0 : index
    %18 = vector.load %arg6[%c0_11, %c0_12] : memref<48x96xbf16, #tpu.memory_space<vmem>>, vector<48x96xbf16>
    %cst_13 = arith.constant dense<0.000000e+00> : vector<48x256xf32>
    %19 = tpu.matmul %18, %17, %cst_13 {dimension_numbers = #tpu.dot_dimension_numbers<[1], [0], [0], [1], [0, 0, 1, 1], [], []>} : vector<48x96xbf16>, vector<96x256xbf16>, vector<48x256xf32> -> vector<48x256xf32>
    %c0_14 = arith.constant 0 : index
    %c0_15 = arith.constant 0 : index
    %20 = vector.load %arg7[%c0_14, %c0_15] : memref<48x1xf32, #tpu.memory_space<vmem>>, vector<48x1xf32>
    %21 = vector.broadcast %20 : vector<48x1xf32> to vector<48x256xf32>
    %22 = arith.addf %19, %21 : vector<48x256xf32>
    %c0_16 = arith.constant 0 : index
    %c0_17 = arith.constant 0 : index
    %c0_18 = arith.constant 0 : index
    %23 = vector.load %arg8[%c0_16, %c0_17, %c0_18] : memref<1x48x256xf32, #tpu.memory_space<vmem>>, vector<1x48x256xf32>
    %24 = vector.shape_cast %23 : vector<1x48x256xf32> to vector<48x256xf32>
    %25 = vector.shape_cast %22 : vector<48x256xf32> to vector<1x48x256xf32>
    tpu.vector_store %arg8[%c0_16, %c0_17, %c0_18], %25 {strides = array<i32>} : memref<1x48x256xf32, #tpu.memory_space<vmem>>, vector<1x48x256xf32>,
    return
  }
  func.func @transform_0(%arg0: i32, %arg1: i32) -> (i32, i32, i32) {
    %c0_i32 = arith.constant 0 : i32
    %c0_i32_0 = arith.constant 0 : i32
    return %arg0, %c0_i32, %arg1 : i32, i32, i32
  }
  func.func @transform_1(%arg0: i32, %arg1: i32) -> (i32, i32, i32) {
    %c0_i32 = arith.constant 0 : i32
    %c0_i32_0 = arith.constant 0 : i32
    return %arg0, %c0_i32, %arg1 : i32, i32, i32
  }
  func.func @transform_2(%arg0: i32, %arg1: i32) -> (i32, i32, i32) {
    %c0_i32 = arith.constant 0 : i32
    %c0_i32_0 = arith.constant 0 : i32
    %c0_i32_1 = arith.constant 0 : i32
    return %arg0, %c0_i32, %c0_i32_0 : i32, i32, i32
  }
  func.func @transform_3(%arg0: i32, %arg1: i32) -> (i32, i32, i32) {
    %c0_i32 = arith.constant 0 : i32
    %c0_i32_0 = arith.constant 0 : i32
    %c0_i32_1 = arith.constant 0 : i32
    return %arg0, %c0_i32, %c0_i32_0 : i32, i32, i32
  }
  func.func @transform_4(%arg0: i32, %arg1: i32) -> (i32, i32) {
    %c0_i32 = arith.constant 0 : i32
    %c0_i32_0 = arith.constant 0 : i32
    %c0_i32_1 = arith.constant 0 : i32
    return %c0_i32, %c0_i32_0 : i32, i32
  }
  func.func @transform_5(%arg0: i32, %arg1: i32) -> (i32, i32) {
    %c0_i32 = arith.constant 0 : i32
    %c0_i32_0 = arith.constant 0 : i32
    %c0_i32_1 = arith.constant 0 : i32
    return %c0_i32, %c0_i32_0 : i32, i32
  }
  func.func @transform_6(%arg0: i32, %arg1: i32) -> (i32, i32, i32) {
    %c0_i32 = arith.constant 0 : i32
    %c0_i32_0 = arith.constant 0 : i32
    return %arg0, %c0_i32, %arg1 : i32, i32, i32
  }
}

</mosaic_0001>

<bundles_post_ra>
// kernel: cresnet_block_conv1d.3
= control target key start
LH: loop header
LB: loop body
LE: loop exit
PB: predicated region body
PF: predicated region fallthrough
CT: control target
= control target key end

     0   :  { %s548_s9 = smov 0   ;;  %s550_s10 = smov 0   ;;  %s588_s0 = inlined_call_operand.vmem [shape: f32[4,32,256], index: 0, kind: input, shape index: {}]   ;;  %s589_s1 = inlined_call_operand.vmem [shape: f32[4,8,32], index: 1, kind: output, shape index: {0}]   ;;  %s590_s2 = inlined_call_operand.vmem [shape: f32[4,8,32], index: 2, kind: output, shape index: {1}]  }
   0x1   :  { %s552_s11 = smov 0  }
   0x2 LB: > { %s25_s12 = sadd.s32 1, %s526_s10  ;;  %p459_p0 = scmp.ge.s32.totalorder %s530_s11, 1  ;;  %s530_s11 = sphi %s552_s11, %s13_s11   ;;  %s526_s10 = sphi %s550_s10, %s592_s10   ;;  %s522_s9 = sphi %s548_s9, %s591_s9  }
   0x3   : > { %p27_p1 = scmp.ge.s32.totalorder %s25_s12, 4  ;;  %p138_p2 = scmp.lt.s32.totalorder %s530_s11, 5 }
   0x5   : > { %s594_s12 = smov (%p27_p1, %s25_s12), 0  ;;  %p139_p3 = pnand %p459_p0, %p138_p2 }
   0x6   : > { %p170_p4 = scmp.lt.s32.totalorder (!%p139_p3), %s522_s9, 3  ;;  %v532_v0 = vmov (!%p139_p3), 1.0   ;;  %vm269_vm0 = vcmask (!%p139_p3), 261120  }
   0x7   : > { %142 = sbr.rel (%p139_p3) target bundleno = 251 (0xfb), region = 24  ;;  %263 = vmatprep.mubr.f32.mxu0 (!%p139_p3), %v532_v0  ;;  %343 = vmatprep.mubr.f32.mxu1 (!%p139_p3), %v532_v0 }
   0xe   : > { %s596_s9 = smov (!%p170_p4, %s522_s9), 3 }
   0xf   : > { %s466_s13 = sshll.u32 %s596_s9, 6  ;;  %s462_s17 = sshll.u32 %s596_s9, 3 }
  0x10   : > { %s177_s16 = scalar_lea.vmem %s588_s0, %s466_s13  ;;  %s183_s20 = scalar_lea.vmem %s589_s1, %s462_s17 }
  0x11   : > { %v192_v1 = vld [vmem:[%s177_s16 + $0x8] sm:$0xff]  ;;  %v194_v2 = vld [vmem:[%s177_s16 + $0x18] sm:$0xff]  ;;  %v191_v3 = vld [vmem:[%s177_s16] sm:$0xff]  ;;  %s189_s23 = scalar_lea.vmem %s590_s2, %s462_s17 }
  0x12   : > { %v467_v4 = vpack.c.bf16 %v194_v2, %v192_v1  ;;  %v193_v5 = vld [vmem:[%s177_s16 + $0x10] sm:$0xff]  ;;  %v272_v6 = vmul.f32 %v192_v1, %v192_v1  ;;  %v274_v7 = vmul.f32 %v194_v2, %v194_v2  ;;  %v271_v8 = vmul.f32 %v191_v3, %v191_v3  ;;  %v196_v9 = vld [vmem:[%s177_s16 + $0x28] sm:$0xff]  ;;  %v198_v10 = vld [vmem:[%s177_s16 + $0x38] sm:$0xff] }
  0x13   : > { %v469_v11 = vpack.c.bf16 %v193_v5, %v191_v3  ;;  %v273_v12 = vmul.f32 %v193_v5, %v193_v5  ;;  %v471_v13 = vpack.c.bf16 %v198_v10, %v196_v9  ;;  %v276_v14 = vmul.f32 %v196_v9, %v196_v9  ;;  %v195_v16 = vld [vmem:[%s177_s16 + $0x20] sm:$0xff]  ;;  %v197_v17 = vld [vmem:[%s177_s16 + $0x30] sm:$0xff] }
  0x14   : > { %468 = vmatprep.subr.bf16.mxu0 %v467_v4  ;;  %v475_v15 = vpack.c.bf16 %v274_v7, %v272_v6  ;;  %v278_v18 = vmul.f32 %v198_v10, %v198_v10  ;;  %v275_v21 = vmul.f32 %v195_v16, %v195_v16  ;;  %v277_v22 = vmul.f32 %v197_v17, %v197_v17 }
  0x15   : > { %470 = vmatpush1.bf16.xpose.msra.mxu0 %v469_v11  ;;  %v477_v19 = vpack.c.bf16 %v273_v12, %v271_v8  ;;  %v473_v23 = vpack.c.bf16 %v197_v17, %v195_v16 }
  0x16   : > { %476 = vmatprep.subr.bf16.mxu1 %v475_v15  ;;  %472 = vmatprep.subr.bf16.mxu0 %v471_v13  ;;  %v479_v20 = vpack.c.bf16 %v278_v18, %v276_v14  ;;  %v481_v24 = vpack.c.bf16 %v277_v22, %v275_v21 }
  0x17   : > { %478 = vmatpush1.bf16.xpose.msra.mxu1 %v477_v19 }
  0x18   : > { %480 = vmatprep.subr.bf16.mxu1 %v479_v20 }
  0x1d   : > { %474 = vmatpush1.bf16.xpose.msra.mxu0 %v473_v23 }
  0x1f   : > { %482 = vmatpush1.bf16.xpose.msra.mxu1 %v481_v24 }
  0x24   : > { %264 = vmatmul.mubr.f32.vlgmr.msra.gmra.mrb[0].mxu0 %v532_v0 }
  0x26   : > { %344 = vmatmul.mubr.f32.vlgmr.msra.gmra.mrb[0].mxu1 %v532_v0 }
  0xf7   : > { %v265_v25 = vpop.f32.mrb[0].mxu0 }
  0xf8   : > { %270 = vst.msk [vmem:[%s183_s20] sm:$0xff] %vm269_vm0, %v265_v25  ;;  %v267_v26 = vpop.f32.mrb[1].mxu0 }
  0xf9   : > { %v345_v27 = vpop.f32.mrb[0].mxu1 }
  0xfa   : > { %349 = vst.msk [vmem:[%s189_s23] sm:$0xff] %vm269_vm0, %v345_v27  ;;  %v347_v28 = vpop.f32.mrb[1].mxu1 }
  0xfb PF: > { %s13_s11 = sadd.s32 1, %s530_s11   ;;  %s591_s9 = smov %s526_s10 }
  0xfc   : > { %p10_p5 = scmp.ge.s32.totalorder %s13_s11, 6   ;;  %s592_s10 = smov %s594_s12 }
  0xfe   :  { %12 = sbr.rel (!%p10_p5) target bundleno = 2 (0x2), region = 66 }

// kernel: cresnet_block_conv1d.5
= control target key start
LH: loop header
LB: loop body
LE: loop exit
PB: predicated region body
PF: predicated region fallthrough
CT: control target
= control target key end

     0   :  { %11 = vsyncpa [#allocation3], 0  ;;  %s1258_s0 = inlined_call_operand.vmem [shape: bf16[4,64,256], index: 0, kind: input, shape index: {}]   ;;  %s1259_s1 = inlined_call_operand.vmem [shape: f32[4,32,256], index: 1, kind: input, shape index: {}]   ;;  %s1260_s2 = inlined_call_operand.vmem [shape: f32[4,64,1], index: 2, kind: input, shape index: {}]   ;;  %s1261_s3 = inlined_call_operand.vmem [shape: f32[4,64,1], index: 3, kind: input, shape index: {}]   ;;  %s1262_s4 = inlined_call_operand.vmem [shape: bf16[48,96], index: 4, kind: input, shape index: {}]   ;;  %s1263_s5 = inlined_call_operand.vmem [shape: f32[48,1], index: 5, kind: input, shape index: {}]   ;;  %s1264_s6 = inlined_call_operand.hbm [shape: f32[4,48,256], index: 6, kind: output, shape index: {}]  }
   0x1   :  { %13 = vsyncpa [#allocation3 + $0x1], 0  ;;  %s1047_s21 = smov 0   ;;  %s1049_s22 = smov 0  }
   0x2   :  { %s1051_s23 = smov 0   ;;  %s1053_s24 = smov 0  }
   0x3   :  { %s1055_s25 = smov 0   ;;  %s1057_s26 = smov 0  }
   0x4 LB: > { %s825_s27 = sadd.s32 4294967295, %s1006_s26   ;;  %s826_s28 = sadd.s32 4294967294, %s1006_s26   ;;  %s1006_s26 = sphi %s1057_s26, %s19_s26   ;;  %s1002_s25 = sphi %s1055_s25, %s1271_s25   ;;  %s998_s24 = sphi %s1053_s24, %s1270_s24   ;;  %s994_s23 = sphi %s1051_s23, %s1269_s23   ;;  %s990_s22 = sphi %s1049_s22, %s1268_s22   ;;  %s986_s21 = sphi %s1047_s21, %s1267_s21  }
   0x5   : > { %s31_s29 = sadd.s32 1, %s1002_s25  ;;  %s190_s30 = sadd.s32 1, %s994_s23 }
   0x6   : > { %p33_p0 = scmp.ge.s32.totalorder %s31_s29, 4  ;;  %p200_p1 = scmp.ne.s32.totalorder %s994_s23, %s990_s22 }
   0x7   : > { %p201_p2 = scmp.eq.s32.totalorder %s825_s27, 3  ;;  %p206_p3 = scmp.ne.s32.totalorder %s990_s22, %s986_s21 }
   0x8   : > { %s1273_s29 = smov (%p33_p0, %s31_s29), 0  ;;  %p207_p5 = scmp.eq.s32.totalorder %s826_s28, 3 }
   0x9   : > { %p1087_p4 = por %p201_p2, %p200_p1  ;;  %s185_s8 = ssub.s32 %s1002_s25, %s1273_s29 }
   0xa   : > { %p829_p6 = scmp.ge.s32.totalorder %s1006_s26, 1  ;;  %p188_p7 = scmp.eq.s32.totalorder %s185_s8, 0 }
   0xb   : > { %p1094_p8 = por %p207_p5, %p206_p3  ;;  %p273_p9 = scmp.lt.s32.totalorder %s1006_s26, 5 }
   0xc   : > { %s1100_s10 = scalar_select %p188_p7, %s994_s23, %s190_s30  }
   0xd   : > { %p274_p10 = pnand %p829_p6, %p273_p9 }
   0xe   : > { %p327_p11 = scmp.lt.s32.totalorder (!%p274_p10), %s998_s24, 3  ;;  %v1008_v0 = vmov (!%p274_p10), 0   ;;  %v553_v17 = vld [vmem:[%s1263_s5 + $0x8] sm:$0xff] (!%p274_p10)  ;;  %v552_v18 = vld [vmem:[%s1263_s5] sm:$0xff] (!%p274_p10)  ;;  %v555_v19 = vld [vmem:[%s1263_s5 + $0x18] sm:$0xff] (!%p274_p10)  ;;  %vm603_vm0 = vcmask (!%p274_p10), 785408  }
   0xf   : > { %277 = sbr.rel (%p274_p10) target bundleno = 442 (0x1ba), region = 44  ;;  %924 = vset.pattern.permute.xlu1 (!%p274_p10), %v1008_v0  ;;  %923 = vset.pattern.permute.xlu0 (!%p274_p10), %v1008_v0  ;;  %v554_v20 = vld [vmem:[%s1263_s5 + $0x10] sm:$0xff] (!%p274_p10)  ;;  %v557_v21 = vld [vmem:[%s1263_s5 + $0x28] sm:$0xff] (!%p274_p10)  ;;  %v556_v22 = vld [vmem:[%s1263_s5 + $0x20] sm:$0xff] (!%p274_p10)  ;;  %s323_s16 = sand.u32 (!%p274_p10), 1, %s990_s22  }
  0x10   : > { %645 = vmatprep.mubr.bf16.mxu0 (!%p274_p10), %v1008_v0  ;;  %655 = vmatprep.mubr.bf16.mxu1 (!%p274_p10), %v1008_v0  ;;  %s863_s17 = smul.u32 (!%p274_p10), 96, %s323_s16  ;;  %s1009_s8 = smov (!%p274_p10), [#allocation2]  }
  0x11   : > { %s864_s19 = smul.u32 (!%p274_p10), 1536, %s998_s24 }
  0x13   : > { %s1206_s28 = scalar_lea.hbm (!%p274_p10), %s1264_s6, %s864_s19 }
  0x16   : > { %s328_s11 = scalar_select %p327_p11, %s998_s24, 3 }
  0x18   : > { %s1108_s12 = sshll.u32 %s328_s11, 6  ;;  %s932_s11 = sshll.u32 %s1009_s8, 4  ;;  %s933_s11 = int_to_ptr.vmem [resolvable:$false] %s932_s11 }
  0x19   : > { %s1114_s15 = scalar_lea.vmem %s1261_s3, %s1108_s12  ;;  %s350_s18 = scalar_lea.vmem %s1260_s2, %s1108_s12 }
  0x1a   : > { %v454_v1 = vld [vmem:[%s1114_s15] sm:$0xff]  ;;  %v455_v3 = vld [vmem:[%s1114_s15 + $0x8] sm:$0xff]  ;;  %v393_v5 = vld [vmem:[%s350_s18 + $0x18] sm:$0xff]  ;;  %s1150_s20 = scalar_lea.vmem %s1258_s0, %s1108_s12  ;;  %s1164_s30 = scalar_lea.vmem %s1259_s1, %s1108_s12 }
  0x1b   : > { %v390_v2 = vld [vmem:[%s350_s18] sm:$0xff]  ;;  %464 = vperm.xlu1 %924, %v454_v1   ;;  %v391_v4 = vld [vmem:[%s350_s18 + $0x8] sm:$0xff]  ;;  %v392_v6 = vld [vmem:[%s350_s18 + $0x10] sm:$0xff]  ;;  %s934_s13 = scalar_lea.vmem %s933_s11, 3072 }
  0x1c   : > { %400 = vperm.xlu0 %923, %v390_v2   ;;  %v457_v7 = vld [vmem:[%s1114_s15 + $0x18] sm:$0xff]  ;;  %v456_v8 = vld [vmem:[%s1114_s15 + $0x10] sm:$0xff]  ;;  %v395_v9 = vld [vmem:[%s350_s18 + $0x28] sm:$0xff] }
  0x1d   : > { %v394_v10 = vld [vmem:[%s350_s18 + $0x20] sm:$0xff]  ;;  %v459_v11 = vld [vmem:[%s1114_s15 + $0x28] sm:$0xff]  ;;  %v397_v13 = vld [vmem:[%s350_s18 + $0x38] sm:$0xff] }
  0x1e   : > { %v458_v12 = vld [vmem:[%s1114_s15 + $0x20] sm:$0xff]  ;;  %v396_v14 = vld [vmem:[%s350_s18 + $0x30] sm:$0xff]  ;;  %v461_v15 = vld [vmem:[%s1114_s15 + $0x38] sm:$0xff]  ;;  %s1187_s18 = scalar_lea.vmem [#allocation2], %s863_s17 }
  0x1f   : > { %469 = vperm.xlu1 %924, %v455_v3   ;;  %v460_v16 = vld [vmem:[%s1114_s15 + $0x30] sm:$0xff]  ;;  %v358_v23 = vld [vmem:[%s1150_s20] sm:$0xff]  ;;  %v359_v26 = vld [vmem:[%s1150_s20 + $0x8] sm:$0xff] }
  0x20   : > { %405 = vperm.xlu0 %923, %v391_v4   ;;  %v366_v24 = vunpack.c.l.bf16 %v358_v23  ;;  %v367_v25 = vunpack.c.h.bf16 %v358_v23  ;;  %v368_v29 = vunpack.c.l.bf16 %v359_v26  ;;  %v369_v30 = vunpack.c.h.bf16 %v359_v26  ;;  %v361_v33 = vld [vmem:[%s1150_s20 + $0x18] sm:$0xff]  ;;  %v360_v36 = vld [vmem:[%s1150_s20 + $0x10] sm:$0xff]  ;;  %v363_v57 = vld [vmem:[%s1150_s20 + $0x28] sm:$0xff] }
  0x21   : > { %v372_v41 = vunpack.c.l.bf16 %v361_v33  ;;  %v373_v42 = vunpack.c.h.bf16 %v361_v33  ;;  %v370_v45 = vunpack.c.l.bf16 %v360_v36  ;;  %v371_v46 = vunpack.c.h.bf16 %v360_v36  ;;  %v362_v58 = vld [vmem:[%s1150_s20 + $0x20] sm:$0xff] }
  0x22   : > { %v376_v4 = vunpack.c.l.bf16 %v363_v57 }
  0x23   : > { %415 = vperm.xlu1 %924, %v393_v5   ;;  %v377_v5 = vunpack.c.h.bf16 %v363_v57 }
  0x24   : > { %410 = vperm.xlu0 %923, %v392_v6   ;;  %v374_v6 = vunpack.c.l.bf16 %v362_v58 }
  0x27   : > { %479 = vperm.xlu1 %924, %v457_v7   ;;  %v375_v7 = vunpack.c.h.bf16 %v362_v58 }
  0x28   : > { %474 = vperm.xlu0 %923, %v456_v8  }
  0x2b   : > { %425 = vperm.xlu1 %924, %v395_v9  }
  0x2c   : > { %420 = vperm.xlu0 %923, %v394_v10  }
  0x2f   : > { %489 = vperm.xlu1 %924, %v459_v11  }
  0x30   : > { %484 = vperm.xlu0 %923, %v458_v12  }
  0x33   : > { %435 = vperm.xlu1 %924, %v397_v13  }
  0x34   : > { %430 = vperm.xlu0 %923, %v396_v14  }
  0x37   : > { %499 = vperm.xlu1 %924, %v461_v15  }
  0x38   : > { %494 = vperm.xlu0 %923, %v460_v16  }
  0x3b   : > { %565 = vperm.xlu1 %924, %v553_v17  }
  0x3c   : > { %560 = vperm.xlu0 %923, %v552_v18  }
  0x3f   : > { %575 = vperm.xlu1 %924, %v555_v19  }
  0x40   : > { %570 = vperm.xlu0 %923, %v554_v20   ;;  %v365_v20 = vld [vmem:[%s1150_s20 + $0x38] sm:$0xff] }
  0x43   : > { %585 = vperm.xlu1 %924, %v557_v21   ;;  %v364_v21 = vld [vmem:[%s1150_s20 + $0x30] sm:$0xff]  ;;  %s704_s20 = sshll.u32 %s1187_s18, 4  ;;  %s1200_s20 = int_to_ptr.vmem [resolvable:$true] %s704_s20 }
  0x44   : > { %580 = vperm.xlu0 %923, %v556_v22   ;;  %s928_s12 = scalar_lea.vmem %s1200_s20, 1536  ;;  %p935_p1 = scmp.lt.s32.totalorder %s1200_s20, %s933_s11 }
  0x45   : > { %p929_p12 = scmp.ne.s32.totalorder %s1200_s20, %s928_s12  ;;  %p936_p2 = scmp.lt.s32.totalorder %s934_s13, %s928_s12 }
  0x47   : > { %p930_p13 = pnand %p929_p12, %p1087_p4  ;;  %p937_p3 = por %p936_p2, %p935_p1 }
  0x49   : > { %p931_p0 = pneg %p930_p13 }
  0x4b   : > { %p938_p5 = pnand %p937_p3, %p931_p0 }
  0x9a   : > { %v465_v27 = vpop.permute.xlu1 %464 }
  0x9b   : > { %v401_v28 = vpop.permute.xlu0 %400 }
  0x9c   : > { %v438_v31 = vmul.f32 %v401_v28, %v366_v24  ;;  %v439_v32 = vmul.f32 %v401_v28, %v367_v25  ;;  %v380_v28 = vunpack.c.l.bf16 %v365_v20 }
  0x9e   : > { %v470_v34 = vpop.permute.xlu1 %469  ;;  %v502_v39 = vadd.f32 %v465_v27, %v438_v31  ;;  %v503_v40 = vadd.f32 %v465_v27, %v439_v32  ;;  %v379_v31 = vunpack.c.h.bf16 %v364_v21 }
  0x9f   : > { %v406_v35 = vpop.permute.xlu0 %405 }
  0xa0   : > { %v440_v37 = vmul.f32 %v406_v35, %v368_v29  ;;  %v441_v38 = vmul.f32 %v406_v35, %v369_v30  ;;  %v519_v49 = vmax.f32 %v503_v40, 0.0  ;;  %v518_v51 = vmax.f32 %v502_v39, 0.0 }
  0xa1   : > { %v381_v29 = vunpack.c.h.bf16 %v365_v20  ;;  %v378_v30 = vunpack.c.l.bf16 %v364_v21 }
  0xa2   : > { %v504_v43 = vadd.f32 %v470_v34, %v440_v37  ;;  %v505_v44 = vadd.f32 %v470_v34, %v441_v38  ;;  %v416_v47 = vpop.permute.xlu1 %415 }
  0xa3   : > { %v411_v48 = vpop.permute.xlu0 %410  ;;  %v444_v53 = vmul.f32 %v416_v47, %v372_v41  ;;  %v445_v54 = vmul.f32 %v416_v47, %v373_v42 }
  0xa4   : > { %v521_v50 = vmax.f32 %v505_v44, 0.0  ;;  %v520_v52 = vmax.f32 %v504_v43, 0.0  ;;  %v442_v55 = vmul.f32 %v411_v48, %v370_v45  ;;  %v443_v56 = vmul.f32 %v411_v48, %v371_v46 }
  0xa6   : > { %v480_v59 = vpop.permute.xlu1 %479  ;;  %v535_v61 = vpack.c.bf16 %v521_v50, %v519_v49  ;;  %v534_v62 = vpack.c.bf16 %v520_v52, %v518_v51  ;;  %v383_v50 = vld [vmem:[%s1164_s30 + $0x8] sm:$0xff]  ;;  %v385_v51 = vld [vmem:[%s1164_s30 + $0x18] sm:$0xff] }
  0xa7   : > { %v475_v60 = vpop.permute.xlu0 %474  ;;  %v508_v63 = vadd.f32 %v480_v59, %v444_v53  ;;  %v509_v1 = vadd.f32 %v480_v59, %v445_v54  ;;  %v543_v58 = vpack.c.bf16 %v385_v51, %v383_v50  ;;  %v382_v59 = vld [vmem:[%s1164_s30] sm:$0xff] }
  0xa8   : > { %v506_v2 = vadd.f32 %v475_v60, %v442_v55  ;;  %v507_v3 = vadd.f32 %v475_v60, %v443_v56  ;;  %613 = vmatprep.subr.bf16.mxu0 %v535_v61  ;;  %851 = vmatprep.subr.bf16.mxu1 %v535_v61  ;;  %v384_v60 = vld [vmem:[%s1164_s30 + $0x10] sm:$0xff]  ;;  %v387_v61 = vld [vmem:[%s1164_s30 + $0x28] sm:$0xff] }
  0xa9   : > { %v524_v8 = vmax.f32 %v508_v63, 0.0  ;;  %v525_v9 = vmax.f32 %v509_v1, 0.0  ;;  %614 = vmatpush1.bf16.msra.mxu0 %v534_v62  ;;  %857 = vmatpush1.bf16.msra.mxu1 %v534_v62  ;;  %v389_v62 = vld [vmem:[%s1164_s30 + $0x38] sm:$0xff]  ;;  %v542_v63 = vpack.c.bf16 %v384_v60, %v382_v59 }
  0xaa   : > { %v522_v10 = vmax.f32 %v506_v2, 0.0  ;;  %v523_v11 = vmax.f32 %v507_v3, 0.0  ;;  %v426_v12 = vpop.permute.xlu1 %425  ;;  %v545_v1 = vpack.c.bf16 %v389_v62, %v387_v61  ;;  %v386_v2 = vld [vmem:[%s1164_s30 + $0x20] sm:$0xff]  ;;  %v388_v3 = vld [vmem:[%s1164_s30 + $0x30] sm:$0xff]  ;;  %s1212_s30 = scalar_lea.sflag [#allocation3], %s323_s16 }
  0xab   : > { %v421_v13 = vpop.permute.xlu0 %420  ;;  %v448_v16 = vmul.f32 %v426_v12, %v376_v4  ;;  %v449_v17 = vmul.f32 %v426_v12, %v377_v5  ;;  %v544_v4 = vpack.c.bf16 %v388_v3, %v386_v2  ;;  %v925_v5 = vld [vmem:[%s1262_s4] sm:$0xff]  }
  0xac   : > { %v537_v14 = vpack.c.bf16 %v525_v9, %v523_v11  ;;  %v536_v15 = vpack.c.bf16 %v524_v8, %v522_v10  ;;  %v446_v18 = vmul.f32 %v421_v13, %v374_v6  ;;  %v447_v19 = vmul.f32 %v421_v13, %v375_v7  ;;  %v926_v6 = vld [vmem:[%s1262_s4 + $0x8] sm:$0xff]   ;;  %v927_v7 = vld [vmem:[%s1262_s4 + $0x10] sm:$0xff]  }
  0xae   : > { %615 = vmatprep.subr.bf16.mxu0 %v537_v14  ;;  %852 = vmatprep.subr.bf16.mxu1 %v537_v14  ;;  %v490_v22 = vpop.permute.xlu1 %489 }
  0xaf   : > { %v485_v23 = vpop.permute.xlu0 %484  ;;  %v512_v24 = vadd.f32 %v490_v22, %v448_v16  ;;  %v513_v25 = vadd.f32 %v490_v22, %v449_v17  ;;  %616 = vmatpush1.bf16.msra.mxu0 %v536_v15  ;;  %858 = vmatpush1.bf16.msra.mxu1 %v536_v15 }
  0xb0   : > { %v510_v26 = vadd.f32 %v485_v23, %v446_v18  ;;  %v511_v27 = vadd.f32 %v485_v23, %v447_v19 }
  0xb1   : > { %v528_v32 = vmax.f32 %v512_v24, 0.0  ;;  %v529_v33 = vmax.f32 %v513_v25, 0.0 }
  0xb2   : > { %v526_v34 = vmax.f32 %v510_v26, 0.0  ;;  %v527_v35 = vmax.f32 %v511_v27, 0.0  ;;  %v436_v36 = vpop.permute.xlu1 %435 }
  0xb3   : > { %v431_v37 = vpop.permute.xlu0 %430  ;;  %v452_v40 = vmul.f32 %v436_v36, %v380_v28  ;;  %v453_v41 = vmul.f32 %v436_v36, %v381_v29 }
  0xb4   : > { %v539_v38 = vpack.c.bf16 %v529_v33, %v527_v35  ;;  %v538_v39 = vpack.c.bf16 %v528_v32, %v526_v34  ;;  %v450_v42 = vmul.f32 %v431_v37, %v378_v30  ;;  %v451_v43 = vmul.f32 %v431_v37, %v379_v31 }
  0xb6   : > { %617 = vmatprep.subr.bf16.mxu0 %v539_v38  ;;  %853 = vmatprep.subr.bf16.mxu1 %v539_v38  ;;  %v500_v44 = vpop.permute.xlu1 %499 }
  0xb7   : > { %v495_v45 = vpop.permute.xlu0 %494  ;;  %v516_v46 = vadd.f32 %v500_v44, %v452_v40  ;;  %v517_v47 = vadd.f32 %v500_v44, %v453_v41  ;;  %618 = vmatpush1.bf16.msra.mxu0 %v538_v39  ;;  %859 = vmatpush1.bf16.msra.mxu1 %v538_v39 }
  0xb8   : > { %v514_v48 = vadd.f32 %v495_v45, %v450_v42  ;;  %v515_v49 = vadd.f32 %v495_v45, %v451_v43 }
  0xb9   : > { %v532_v52 = vmax.f32 %v516_v46, 0.0  ;;  %v533_v53 = vmax.f32 %v517_v47, 0.0 }
  0xba   : > { %v530_v54 = vmax.f32 %v514_v48, 0.0  ;;  %v531_v55 = vmax.f32 %v515_v49, 0.0  ;;  %v566_v8 = vpop.permute.xlu1 %565 }
  0xbb   : > { %v561_v9 = vpop.permute.xlu0 %560 }
  0xbc   : > { %v541_v56 = vpack.c.bf16 %v533_v53, %v531_v55  ;;  %v540_v57 = vpack.c.bf16 %v532_v52, %v530_v54 }
  0xbe   : > { %619 = vmatprep.subr.bf16.mxu0 %v541_v56  ;;  %854 = vmatprep.subr.bf16.mxu1 %v541_v56  ;;  %v576_v10 = vpop.permute.xlu1 %575 }
  0xbf   : > { %620 = vmatpush1.bf16.msra.mxu0 %v540_v57  ;;  %860 = vmatpush1.bf16.msra.mxu1 %v540_v57  ;;  %v571_v11 = vpop.permute.xlu0 %570 }
  0xc0   : > { %621 = vmatprep.subr.bf16.mxu0 %v543_v58  ;;  %855 = vmatprep.subr.bf16.mxu1 %v543_v58 }
  0xc2   : > { %v586_v31 = vpop.permute.xlu1 %585 }
  0xc3   : > { %622 = vmatpush1.bf16.msra.mxu0 %v542_v63  ;;  %861 = vmatpush1.bf16.msra.mxu1 %v542_v63  ;;  %v581_v27 = vpop.permute.xlu0 %580 }
  0xc4   : > { %623 = vmatprep.subr.bf16.mxu0 %v545_v1  ;;  %856 = vmatprep.subr.bf16.mxu1 %v545_v1 }
  0xc7   : > { %624 = vmatpush1.bf16.msra.mxu0 %v544_v4  ;;  %862 = vmatpush1.bf16.msra.mxu1 %v544_v4 }
  0xca   : > { %841 = vmatmul.mubr.msk.bf16.vlgmr.msra.gmra.mrb[0].mxu0 %vm603_vm0, %v925_v5  ;;  %842 = vmatmul.mubr.msk.bf16.vlgmr.msra.gmra.mrb[0].mxu1 %vm603_vm0, %v926_v6 }
  0xcb   : > { %665 = vmatprep.mubr.bf16.mxu1 %v1008_v0 }
  0xd2   : > { %843 = vmatmul.mubr.msk.bf16.gmra.mrb[4].mxu1 %vm603_vm0, %v927_v7 }
 0x19d   : > { %v647_v12 = vpop.f32.mrb[0].mxu0  ;;  %v657_v13 = vpop.f32.mrb[0].mxu1 }
 0x19e   : > { %v648_v14 = vadd.f32 %v647_v12, %v561_v9  ;;  %v658_v15 = vadd.f32 %v657_v13, %v571_v11  ;;  %v649_v16 = vpop.f32.mrb[1].mxu0  ;;  %v659_v17 = vpop.f32.mrb[1].mxu1 }
 0x19f   : > { %v650_v18 = vadd.f32 %v649_v16, %v561_v9  ;;  %v660_v0 = vadd.f32 %v659_v17, %v571_v11  ;;  %v651_v19 = vpop.f32.mrb[2].mxu0  ;;  %v661_v20 = vpop.f32.mrb[2].mxu1 }
 0x1a0   : > { %676 = vst [vmem:[%s1187_s18] sm:$0xff] %v648_v14  ;;  %680 = vst [vmem:[%s1187_s18 + $0x20] sm:$0xff] %v658_v15  ;;  %v652_v21 = vadd.f32 %v651_v19, %v566_v8  ;;  %v662_v22 = vadd.f32 %v661_v20, %v576_v10  ;;  %v653_v23 = vpop.f32.mrb[3].mxu0  ;;  %v663_v24 = vpop.f32.mrb[3].mxu1 }
 0x1a1   : > { %677 = vst [vmem:[%s1187_s18 + $0x8] sm:$0xff] %v650_v18  ;;  %681 = vst [vmem:[%s1187_s18 + $0x28] sm:$0xff] %v660_v0  ;;  %v654_v25 = vadd.f32 %v653_v23, %v566_v8  ;;  %v664_v26 = vadd.f32 %v663_v24, %v576_v10 }
 0x1a2   : > { %678 = vst [vmem:[%s1187_s18 + $0x10] sm:$0xff] %v652_v21  ;;  %682 = vst [vmem:[%s1187_s18 + $0x30] sm:$0xff] %v662_v22 }
 0x1a3   : > { %679 = vst [vmem:[%s1187_s18 + $0x18] sm:$0xff] %v654_v25  ;;  %683 = vst [vmem:[%s1187_s18 + $0x38] sm:$0xff] %v664_v26 }
 0x1a5   : > { %v667_v28 = vpop.f32.mrb[4].mxu1 }
 0x1a6   : > { %v668_v29 = vadd.f32 %v667_v28, %v581_v27  ;;  %v669_v30 = vpop.f32.mrb[5].mxu1 }
 0x1a7   : > { %v670_v32 = vadd.f32 %v669_v30, %v581_v27  ;;  %v671_v33 = vpop.f32.mrb[6].mxu1 }
 0x1a8   : > { %684 = vst [vmem:[%s1187_s18 + $0x40] sm:$0xff] %v668_v29  ;;  %v672_v34 = vadd.f32 %v671_v33, %v586_v31  ;;  %v673_v35 = vpop.f32.mrb[7].mxu1 }
 0x1a9   : > { %685 = vst [vmem:[%s1187_s18 + $0x48] sm:$0xff] %v670_v32  ;;  %v674_v36 = vadd.f32 %v673_v35, %v586_v31 }
 0x1aa   : > { %686 = vst [vmem:[%s1187_s18 + $0x50] sm:$0xff] %v672_v34 }
 0x1ab   : > { %687 = vst [vmem:[%s1187_s18 + $0x58] sm:$0xff] %v674_v36 }
 0x1ac   : > { %941 = shalt.err (!%p938_p5)
}
 0x1ad   : > { %s942_s14 = scalar_lea.hbm %s1206_s28, 1536  ;;  %s946_s17 = scalar_lea.hbm %s1264_s6, 6144 }
 0x1ae   : > { %p943_p6 = scmp.ne.s32.totalorder %s1206_s28, %s942_s14  ;;  %p947_p10 = scmp.lt.u32.totalorder %s1206_s28, %s1264_s6 }
 0x1af   : > { %p948_p11 = scmp.lt.u32.totalorder %s946_s17, %s942_s14  ;;  %p950_p13 = scmp.lt.u32.totalorder %s942_s14, %s1206_s28 }
 0x1b0   : > { %p944_p7 = pnand %p943_p6, %p1087_p4 }
 0x1b1   : > { %p949_p12 = por %p948_p11, %p947_p10 }
 0x1b2   : > { %p945_p9 = pneg %p944_p7 }
 0x1b3   : > { %p951_p0 = por %p950_p13, %p949_p12 }
 0x1b5   : > { %p952_p1 = pnand %p951_p0, %p945_p9 }
 0x1b7   : > { %955 = shalt.err (!%p952_p1)
}
 0x1b8   : > { %s1010_s27 = smov 256   ;;  %s1011_s24 = smov 16  }
 0x1b9   : > { %865 = dma.vmem_to_hbm [thread:$0]  (%p1087_p4), %s1200_s20, 1536, %s1206_s28, %s1212_s30, %s1010_s27, %s1010_s27, %s1011_s24  }
 0x1ba PF: > { %p871_p2 = scmp.ge.s32.totalorder %s1006_s26, 2  ;;  %s719_s12 = sand.u32 1, %s986_s21  }
 0x1bb   : > { %s720_s8 = scalar_lea.sflag [#allocation3], %s719_s12 }
 0x1bc   : > { %p868_p3 = pnand %p871_p2, %p1094_p8 }
 0x1be   : > { %981 = dma.done.wait (!%p868_p3), %s720_s8, 1536  }
 0x1bf   : > { %983 = vsyncadd (!%p868_p3), %s720_s8, 4294965760  ;;  %s19_s26 = sadd.s32 1, %s1006_s26   ;;  %s1267_s21 = smov %s990_s22 }
 0x1c0   : > { %p16_p5 = scmp.ge.s32.totalorder %s19_s26, 6   ;;  %s1268_s22 = smov %s994_s23 }
 0x1c1   : > { %s1269_s23 = smov %s1100_s10  ;;  %s1270_s24 = smov %s1002_s25 }
 0x1c2   : > { %s1271_s25 = smov %s1273_s29  ;;  %18 = sbr.rel (!%p16_p5) target bundleno = 4 (0x4), region = 88 }
 0x1c9   :  { %725 = vsyncpa [#allocation3], 1 }
 0x1ca   :  { %727 = vsyncpa [#allocation3 + $0x1], 1 }

// kernel: cresnet_block_conv1d.4
= control target key start
LH: loop header
LB: loop body
LE: loop exit
PB: predicated region body
PF: predicated region fallthrough
CT: control target
= control target key end

     0   :  { %s1262_s24 = smov 0   ;;  %s1264_s25 = smov 0   ;;  %s1406_s0 = inlined_call_operand.vmem [shape: f32[4,32,256], index: 0, kind: input, shape index: {}]   ;;  %s1407_s1 = inlined_call_operand.vmem [shape: f32[4,32,1], index: 1, kind: input, shape index: {}]   ;;  %s1408_s2 = inlined_call_operand.vmem [shape: f32[4,32,1], index: 2, kind: input, shape index: {}]   ;;  %s1409_s3 = inlined_call_operand.vmem [shape: bf16[64,32], index: 3, kind: input, shape index: {}]   ;;  %s1410_s4 = inlined_call_operand.vmem [shape: f32[64,1], index: 4, kind: input, shape index: {}]   ;;  %s1411_s5 = inlined_call_operand.vmem [shape: bf16[4,64,256], index: 5, kind: output, shape index: {0}]   ;;  %s1412_s6 = inlined_call_operand.vmem [shape: f32[4,8,64], index: 6, kind: output, shape index: {1}]   ;;  %s1413_s7 = inlined_call_operand.vmem [shape: f32[4,8,64], index: 7, kind: output, shape index: {2}]  }
   0x1   :  { %s1266_s26 = smov 0  }
   0x2 LB: > { %s30_s27 = sadd.s32 1, %s1214_s25  ;;  %p1079_p0 = scmp.ge.s32.totalorder %s1218_s26, 1  ;;  %s1218_s26 = sphi %s1266_s26, %s18_s26   ;;  %s1214_s25 = sphi %s1264_s25, %s1417_s25   ;;  %s1210_s24 = sphi %s1262_s24, %s1416_s24  }
   0x3   : > { %p32_p1 = scmp.ge.s32.totalorder %s30_s27, 4  ;;  %p287_p2 = scmp.lt.s32.totalorder %s1218_s26, 5 }
   0x5   : > { %s1419_s27 = smov (%p32_p1, %s30_s27), 0  ;;  %p288_p3 = pnand %p1079_p0, %p287_p2 }
   0x6   : > { %p348_p4 = scmp.lt.s32.totalorder (!%p288_p3), %s1210_s24, 3  ;;  %v1220_v0 = vmov (!%p288_p3), 0   ;;  %v483_v9 = vld [vmem:[%s1410_s4 + $0x8] sm:$0xff] (!%p288_p3)  ;;  %v482_v10 = vld [vmem:[%s1410_s4] sm:$0xff] (!%p288_p3)  ;;  %v485_v11 = vld [vmem:[%s1410_s4 + $0x18] sm:$0xff] (!%p288_p3)  ;;  %vm550_vm0 = vcmask (!%p288_p3), 261120  }
   0x7   : > { %291 = sbr.rel (%p288_p3) target bundleno = 640 (0x280), region = 40  ;;  %1191 = vset.pattern.permute.xlu1 (!%p288_p3), %v1220_v0  ;;  %1190 = vset.pattern.permute.xlu0 (!%p288_p3), %v1220_v0  ;;  %v484_v12 = vld [vmem:[%s1410_s4 + $0x10] sm:$0xff] (!%p288_p3)  ;;  %v487_v13 = vld [vmem:[%s1410_s4 + $0x28] sm:$0xff] (!%p288_p3)  ;;  %v486_v14 = vld [vmem:[%s1410_s4 + $0x20] sm:$0xff] (!%p288_p3)  ;;  %vm807_vm3 = vcmask (!%p288_p3), 523264  }
   0x8   : > { %595 = vmatprep.mubr.bf16.mxu0 (!%p288_p3), %v1220_v0  ;;  %v489_v15 = vld [vmem:[%s1410_s4 + $0x38] sm:$0xff] (!%p288_p3)  ;;  %v488_v16 = vld [vmem:[%s1410_s4 + $0x30] sm:$0xff] (!%p288_p3)  ;;  %v1192_v61 = vld [vmem:[%s1409_s3] sm:$0xff] (!%p288_p3)  }
   0x9   : > { %v1193_v62 = vld [vmem:[%s1409_s3 + $0x8] sm:$0xff] (!%p288_p3)   ;;  %v1194_v63 = vld [vmem:[%s1409_s3 + $0x10] sm:$0xff] (!%p288_p3)  }
   0xe   : > { %s1421_s24 = smov (!%p348_p4, %s1210_s24), 3 }
   0xf   : > { %s1117_s28 = sshll.u32 %s1421_s24, 5  ;;  %s1116_s9 = sshll.u32 %s1421_s24, 6 }
  0x10   : > { %s366_s8 = scalar_lea.vmem %s1408_s2, %s1117_s28  ;;  %s361_s11 = scalar_lea.vmem %s1407_s1, %s1117_s28 }
  0x11   : > { %v430_v1 = vld [vmem:[%s366_s8] sm:$0xff]  ;;  %v431_v3 = vld [vmem:[%s366_s8 + $0x8] sm:$0xff]  ;;  %v401_v5 = vld [vmem:[%s361_s11 + $0x18] sm:$0xff]  ;;  %s355_s12 = scalar_lea.vmem %s1406_s0, %s1116_s9  ;;  %s1347_s23 = scalar_lea.vmem %s1411_s5, %s1116_s9 }
  0x12   : > { %436 = vperm.xlu1 %1191, %v430_v1   ;;  %v398_v2 = vld [vmem:[%s361_s11] sm:$0xff]  ;;  %v399_v4 = vld [vmem:[%s361_s11 + $0x8] sm:$0xff]  ;;  %v400_v6 = vld [vmem:[%s361_s11 + $0x10] sm:$0xff]  ;;  %s1088_s28 = sshll.u32 %s1421_s24, 3 }
  0x13   : > { %404 = vperm.xlu0 %1190, %v398_v2   ;;  %v433_v7 = vld [vmem:[%s366_s8 + $0x18] sm:$0xff]  ;;  %v432_v8 = vld [vmem:[%s366_s8 + $0x10] sm:$0xff]  ;;  %v390_v17 = vld [vmem:[%s355_s12] sm:$0xff]  ;;  %v1221_v2 = vmov 1.0   ;;  %s381_s8 = scalar_lea.vmem %s1412_s6, %s1088_s28  ;;  %s387_s11 = scalar_lea.vmem %s1413_s7, %s1088_s28 }
  0x14   : > { %v391_v18 = vld [vmem:[%s355_s12 + $0x8] sm:$0xff]  ;;  %v392_v23 = vld [vmem:[%s355_s12 + $0x10] sm:$0xff]  ;;  %v393_v24 = vld [vmem:[%s355_s12 + $0x18] sm:$0xff]  ;;  %801 = vmatprep.mubr.f32.mxu1 %v1221_v2 }
  0x15   : > { %v396_v33 = vld [vmem:[%s355_s12 + $0x30] sm:$0xff]  ;;  %v397_v34 = vld [vmem:[%s355_s12 + $0x38] sm:$0xff]  ;;  %v394_v37 = vld [vmem:[%s355_s12 + $0x20] sm:$0xff] }
  0x16   : > { %441 = vperm.xlu1 %1191, %v431_v3   ;;  %v395_v38 = vld [vmem:[%s355_s12 + $0x28] sm:$0xff]  ;;  %v1195_v1 = vld [vmem:[%s1409_s3 + $0x18] sm:$0xff]   ;;  %v709_v3 = vlaneseq }
  0x17   : > { %409 = vperm.xlu0 %1190, %v399_v4  }
  0x18   : > { %v710_v4 = vand.u32 127, %v709_v3 }
  0x1a   : > { %419 = vperm.xlu1 %1191, %v401_v5   ;;  %v1339_v5 = vadd.s32 128, %v710_v4 }
  0x1b   : > { %414 = vperm.xlu0 %1190, %v400_v6  }
  0x1c   : > { %vm716_vm1 = vcmp.lt.s32.totalorder %v1339_v5, 200 }
  0x1d   : > { %vm1352_vm2 = vmpackc.low %vm716_vm1, %vm716_vm1 }
  0x1e   : > { %451 = vperm.xlu1 %1191, %v433_v7  }
  0x1f   : > { %446 = vperm.xlu0 %1190, %v432_v8  }
  0x22   : > { %497 = vperm.xlu1 %1191, %v483_v9  }
  0x23   : > { %492 = vperm.xlu0 %1190, %v482_v10  }
  0x26   : > { %507 = vperm.xlu1 %1191, %v485_v11  }
  0x27   : > { %502 = vperm.xlu0 %1190, %v484_v12  }
  0x2a   : > { %517 = vperm.xlu1 %1191, %v487_v13  }
  0x2b   : > { %512 = vperm.xlu0 %1190, %v486_v14  }
  0x2e   : > { %527 = vperm.xlu1 %1191, %v489_v15  }
  0x2f   : > { %522 = vperm.xlu0 %1190, %v488_v16  }
  0x91   : > { %v437_v19 = vpop.permute.xlu1 %436 }
  0x92   : > { %v405_v20 = vpop.permute.xlu0 %404 }
  0x93   : > { %v422_v21 = vmul.f32 %v405_v20, %v390_v17  ;;  %v423_v22 = vmul.f32 %v405_v20, %v391_v18 }
  0x95   : > { %v442_v25 = vpop.permute.xlu1 %441  ;;  %v454_v27 = vadd.f32 %v437_v19, %v422_v21  ;;  %v455_v30 = vadd.f32 %v437_v19, %v423_v22 }
  0x96   : > { %v410_v26 = vpop.permute.xlu0 %409 }
  0x97   : > { %v424_v28 = vmul.f32 %v410_v26, %v392_v23  ;;  %v425_v29 = vmul.f32 %v410_v26, %v393_v24  ;;  %v463_v39 = vmax.f32 %v455_v30, 0.0  ;;  %v462_v41 = vmax.f32 %v454_v27, 0.0 }
  0x99   : > { %v456_v31 = vadd.f32 %v442_v25, %v424_v28  ;;  %v420_v32 = vpop.permute.xlu1 %419  ;;  %v457_v35 = vadd.f32 %v442_v25, %v425_v29 }
  0x9a   : > { %v415_v36 = vpop.permute.xlu0 %414  ;;  %v428_v43 = vmul.f32 %v420_v32, %v396_v33  ;;  %v429_v44 = vmul.f32 %v420_v32, %v397_v34 }
  0x9b   : > { %v465_v40 = vmax.f32 %v457_v35, 0.0  ;;  %v464_v42 = vmax.f32 %v456_v31, 0.0  ;;  %v426_v45 = vmul.f32 %v415_v36, %v394_v37  ;;  %v427_v46 = vmul.f32 %v415_v36, %v395_v38 }
  0x9d   : > { %v452_v47 = vpop.permute.xlu1 %451  ;;  %v479_v48 = vpack.c.bf16 %v465_v40, %v463_v39  ;;  %v478_v49 = vpack.c.bf16 %v464_v42, %v462_v41 }
  0x9e   : > { %v460_v50 = vadd.f32 %v452_v47, %v428_v43  ;;  %v461_v51 = vadd.f32 %v452_v47, %v429_v44  ;;  %v447_v52 = vpop.permute.xlu0 %446 }
  0x9f   : > { %v458_v53 = vadd.f32 %v447_v52, %v426_v45  ;;  %v459_v54 = vadd.f32 %v447_v52, %v427_v46  ;;  %563 = vmatprep.subr.bf16.mxu0 %v479_v48 }
  0xa0   : > { %v468_v55 = vmax.f32 %v460_v50, 0.0  ;;  %v469_v56 = vmax.f32 %v461_v51, 0.0  ;;  %564 = vmatpush1.bf16.msra.mxu0 %v478_v49 }
  0xa1   : > { %v466_v57 = vmax.f32 %v458_v53, 0.0  ;;  %v467_v58 = vmax.f32 %v459_v54, 0.0 }
  0xa2   : > { %v493_v6 = vpop.permute.xlu0 %492 }
  0xa3   : > { %v481_v59 = vpack.c.bf16 %v469_v56, %v467_v58  ;;  %v480_v60 = vpack.c.bf16 %v468_v55, %v466_v57 }
  0xa5   : > { %565 = vmatprep.subr.bf16.mxu0 %v481_v59 }
  0xa6   : > { %566 = vmatpush1.bf16.msra.mxu0 %v480_v60  ;;  %v503_v22 = vpop.permute.xlu0 %502 }
  0xa9   : > { %1094 = vmatmul.mubr.msk.bf16.vlgmr.msra.gmra.mrb[0].mxu0 %vm550_vm0, %v1192_v61 }
  0xaa   : > { %605 = vmatprep.mubr.bf16.mxu0 %v1220_v0  ;;  %v513_v48 = vpop.permute.xlu0 %512 }
  0xb1   : > { %1095 = vmatmul.mubr.msk.bf16.gmra.mrb[4].mxu0 %vm550_vm0, %v1193_v62 }
  0xb2   : > { %615 = vmatprep.mubr.bf16.mxu0 %v1220_v0 }
  0xb9   : > { %1096 = vmatmul.mubr.msk.bf16.gmra.mrb[8].mxu0 %vm550_vm0, %v1194_v63 }
  0xba   : > { %625 = vmatprep.mubr.bf16.mxu0 %v1220_v0  ;;  %v498_v0 = vpop.permute.xlu1 %497 }
  0xbe   : > { %v508_v29 = vpop.permute.xlu1 %507 }
  0xc1   : > { %1097 = vmatmul.mubr.msk.bf16.gmra.mrb[12].mxu0 %vm550_vm0, %v1195_v1 }
  0xc2   : > { %889 = vmatprep.mubr.f32.mxu0 %v1221_v2  ;;  %v518_v55 = vpop.permute.xlu1 %517 }
 0x17c   : > { %v597_v7 = vpop.f32.mrb[0].mxu0 }
 0x17d   : > { %v598_v8 = vadd.f32 %v597_v7, %v493_v6  ;;  %v599_v9 = vpop.f32.mrb[1].mxu0 }
 0x17e   : > { %v600_v10 = vadd.f32 %v599_v9, %v493_v6  ;;  %v601_v11 = vpop.f32.mrb[2].mxu0 }
 0x17f   : > { %v602_v12 = vadd.f32 %v601_v11, %v498_v0  ;;  %v603_v13 = vpop.f32.mrb[3].mxu0 }
 0x180   : > { %v1120_v14 = vpack.c.bf16 %v600_v10, %v598_v8  ;;  %v604_v15 = vadd.f32 %v603_v13, %v498_v0 }
 0x181   : > { %v636_v16 = vpack.c.bf16 %v602_v12, %v598_v8 }
 0x182   : > { %684 = vst [vmem:[%s1347_s23] sm:$0xff] %v1120_v14  ;;  %v637_v18 = vpack.c.bf16 %v604_v15, %v600_v10  ;;  %v1121_v19 = vpack.c.bf16 %v604_v15, %v602_v12  ;;  %v523_v12 = vpop.permute.xlu0 %522 }
 0x183   : > { %v692_v20 = vunpack.c.l.bf16 %v636_v16  ;;  %v694_v21 = vunpack.c.h.bf16 %v636_v16 }
 0x184   : > { %685 = vst [vmem:[%s1347_s23 + $0x8] sm:$0xff] %v1121_v19  ;;  %v693_v23 = vunpack.c.l.bf16 %v637_v18  ;;  %v695_v24 = vunpack.c.h.bf16 %v637_v18  ;;  %v607_v25 = vpop.f32.mrb[4].mxu0  ;;  %1130 = vmatprep.subr.msk.bf16.mxu1 %vm1352_vm2, %v637_v18 }
 0x185   : > { %v809_v26 = vmul.f32 %v692_v20, %v692_v20  ;;  %v608_v27 = vadd.f32 %v607_v25, %v503_v22  ;;  %v609_v28 = vpop.f32.mrb[5].mxu0  ;;  %1132 = vmatpush1.bf16.xpose.msra.mxu1 %v636_v16  ;;  %v811_v30 = vmul.f32 %v694_v21, %v694_v21  ;;  %v528_v20 = vpop.permute.xlu1 %527 }
 0x186   : > { %v610_v31 = vadd.f32 %v609_v28, %v503_v22  ;;  %v611_v32 = vpop.f32.mrb[6].mxu0  ;;  %v722_v33 = vsel %vm716_vm1, %v693_v23, 0.0  ;;  %v724_v34 = vsel %vm716_vm1, %v695_v24, 0.0 }
 0x187   : > { %v612_v35 = vadd.f32 %v611_v32, %v508_v29  ;;  %v613_v36 = vpop.f32.mrb[7].mxu0  ;;  %v810_v37 = vmul.f32 %v722_v33, %v722_v33  ;;  %v812_v38 = vmul.f32 %v724_v34, %v724_v34  ;;  %v1150_v45 = vpack.c.bf16 %v811_v30, %v809_v26 }
 0x188   : > { %v1122_v39 = vpack.c.bf16 %v610_v31, %v608_v27  ;;  %v614_v40 = vadd.f32 %v613_v36, %v508_v29 }
 0x189   : > { %v638_v41 = vpack.c.bf16 %v612_v35, %v608_v27  ;;  %v1148_v42 = vpack.c.bf16 %v812_v38, %v810_v37 }
 0x18a   : > { %686 = vst [vmem:[%s1347_s23 + $0x10] sm:$0xff] %v1122_v39  ;;  %v639_v43 = vpack.c.bf16 %v614_v40, %v610_v31  ;;  %v1123_v44 = vpack.c.bf16 %v614_v40, %v612_v35 }
 0x18b   : > { %v696_v46 = vunpack.c.l.bf16 %v638_v41  ;;  %v698_v47 = vunpack.c.h.bf16 %v638_v41  ;;  %1149 = vmatprep.subr.bf16.mxu0 %v1148_v42 }
 0x18c   : > { %687 = vst [vmem:[%s1347_s23 + $0x18] sm:$0xff] %v1123_v44  ;;  %v697_v49 = vunpack.c.l.bf16 %v639_v43  ;;  %v699_v50 = vunpack.c.h.bf16 %v639_v43  ;;  %v617_v51 = vpop.f32.mrb[8].mxu0  ;;  %1135 = vmatprep.subr.msk.bf16.mxu1 %vm1352_vm2, %v639_v43  ;;  %1151 = vmatpush1.bf16.xpose.msra.mxu0 %v1150_v45 }
 0x18d   : > { %v813_v52 = vmul.f32 %v696_v46, %v696_v46  ;;  %v618_v53 = vadd.f32 %v617_v51, %v513_v48  ;;  %v619_v54 = vpop.f32.mrb[9].mxu0  ;;  %1137 = vmatpush1.bf16.xpose.msra.mxu1 %v638_v41  ;;  %v815_v56 = vmul.f32 %v698_v47, %v698_v47 }
 0x18e   : > { %v620_v57 = vadd.f32 %v619_v54, %v513_v48  ;;  %v621_v58 = vpop.f32.mrb[10].mxu0  ;;  %v726_v59 = vsel %vm716_vm1, %v697_v49, 0.0  ;;  %v728_v60 = vsel %vm716_vm1, %v699_v50, 0.0 }
 0x18f   : > { %v622_v61 = vadd.f32 %v621_v58, %v518_v55  ;;  %v623_v62 = vpop.f32.mrb[11].mxu0  ;;  %v814_v63 = vmul.f32 %v726_v59, %v726_v59  ;;  %v816_v1 = vmul.f32 %v728_v60, %v728_v60  ;;  %v1154_v0 = vpack.c.bf16 %v815_v56, %v813_v52 }
 0x190   : > { %v1124_v3 = vpack.c.bf16 %v620_v57, %v618_v53  ;;  %v624_v4 = vadd.f32 %v623_v62, %v518_v55 }
 0x191   : > { %v640_v6 = vpack.c.bf16 %v622_v61, %v618_v53  ;;  %v1152_v7 = vpack.c.bf16 %v816_v1, %v814_v63 }
 0x192   : > { %688 = vst [vmem:[%s1347_s23 + $0x20] sm:$0xff] %v1124_v3  ;;  %v641_v8 = vpack.c.bf16 %v624_v4, %v620_v57  ;;  %v1125_v9 = vpack.c.bf16 %v624_v4, %v622_v61 }
 0x193   : > { %v700_v10 = vunpack.c.l.bf16 %v640_v6  ;;  %v702_v11 = vunpack.c.h.bf16 %v640_v6  ;;  %1153 = vmatprep.subr.bf16.mxu0 %v1152_v7 }
 0x194   : > { %689 = vst [vmem:[%s1347_s23 + $0x28] sm:$0xff] %v1125_v9  ;;  %v701_v13 = vunpack.c.l.bf16 %v641_v8  ;;  %v703_v14 = vunpack.c.h.bf16 %v641_v8  ;;  %v627_v15 = vpop.f32.mrb[12].mxu0  ;;  %1140 = vmatprep.subr.msk.bf16.mxu1 %vm1352_vm2, %v641_v8  ;;  %1155 = vmatpush1.bf16.xpose.msra.mxu0 %v1154_v0 }
 0x195   : > { %v817_v16 = vmul.f32 %v700_v10, %v700_v10  ;;  %v628_v18 = vadd.f32 %v627_v15, %v523_v12  ;;  %v629_v19 = vpop.f32.mrb[13].mxu0  ;;  %1142 = vmatpush1.bf16.xpose.msra.mxu1 %v640_v6  ;;  %v819_v21 = vmul.f32 %v702_v11, %v702_v11 }
 0x196   : > { %v630_v22 = vadd.f32 %v629_v19, %v523_v12  ;;  %v631_v23 = vpop.f32.mrb[14].mxu0  ;;  %v730_v24 = vsel %vm716_vm1, %v701_v13, 0.0  ;;  %v732_v25 = vsel %vm716_vm1, %v703_v14, 0.0 }
 0x197   : > { %v632_v26 = vadd.f32 %v631_v23, %v528_v20  ;;  %v633_v27 = vpop.f32.mrb[15].mxu0  ;;  %v818_v28 = vmul.f32 %v730_v24, %v730_v24  ;;  %v820_v29 = vmul.f32 %v732_v25, %v732_v25  ;;  %v1158_v36 = vpack.c.bf16 %v819_v21, %v817_v16 }
 0x198   : > { %v1126_v30 = vpack.c.bf16 %v630_v22, %v628_v18  ;;  %v634_v31 = vadd.f32 %v633_v27, %v528_v20 }
 0x199   : > { %v642_v32 = vpack.c.bf16 %v632_v26, %v628_v18  ;;  %v1156_v33 = vpack.c.bf16 %v820_v29, %v818_v28 }
 0x19a   : > { %690 = vst [vmem:[%s1347_s23 + $0x30] sm:$0xff] %v1126_v30  ;;  %v643_v34 = vpack.c.bf16 %v634_v31, %v630_v22  ;;  %v1127_v35 = vpack.c.bf16 %v634_v31, %v632_v26 }
 0x19b   : > { %v704_v37 = vunpack.c.l.bf16 %v642_v32  ;;  %v706_v38 = vunpack.c.h.bf16 %v642_v32  ;;  %1157 = vmatprep.subr.bf16.mxu0 %v1156_v33 }
 0x19c   : > { %691 = vst [vmem:[%s1347_s23 + $0x38] sm:$0xff] %v1127_v35  ;;  %v705_v39 = vunpack.c.l.bf16 %v643_v34  ;;  %v707_v40 = vunpack.c.h.bf16 %v643_v34  ;;  %1145 = vmatprep.subr.msk.bf16.mxu1 %vm1352_vm2, %v643_v34  ;;  %1159 = vmatpush1.bf16.xpose.msra.mxu0 %v1158_v36 }
 0x19d   : > { %1147 = vmatpush1.bf16.xpose.msra.mxu1 %v642_v32  ;;  %v821_v41 = vmul.f32 %v704_v37, %v704_v37  ;;  %v823_v42 = vmul.f32 %v706_v38, %v706_v38 }
 0x19e   : > { %v734_v43 = vsel %vm716_vm1, %v705_v39, 0.0  ;;  %v736_v44 = vsel %vm716_vm1, %v707_v40, 0.0 }
 0x19f   : > { %v822_v45 = vmul.f32 %v734_v43, %v734_v43  ;;  %v824_v46 = vmul.f32 %v736_v44, %v736_v44  ;;  %v1162_v48 = vpack.c.bf16 %v823_v42, %v821_v41 }
 0x1a1   : > { %v1160_v47 = vpack.c.bf16 %v824_v46, %v822_v45 }
 0x1a3   : > { %1161 = vmatprep.subr.bf16.mxu0 %v1160_v47 }
 0x1a4   : > { %1163 = vmatpush1.bf16.xpose.msra.mxu0 %v1162_v48  ;;  %802 = vmatmul.mubr.f32.vlgmr.msra.gmra.mrb[0].mxu1 %v1221_v2 }
 0x1ab   : > { %890 = vmatmul.mubr.f32.vlgmr.msra.gmra.mrb[16].mxu0 %v1221_v2 }
 0x277   : > { %v803_v17 = vpop.f32.mrb[0].mxu1 }
 0x278   : > { %808 = vst.msk [vmem:[%s381_s8] sm:$0xff] %vm807_vm3, %v803_v17  ;;  %v805_v5 = vpop.f32.mrb[1].mxu1 }
 0x27e   : > { %v891_v49 = vpop.f32.mrb[16].mxu0 }
 0x27f   : > { %895 = vst.msk [vmem:[%s387_s11] sm:$0xff] %vm807_vm3, %v891_v49  ;;  %v893_v50 = vpop.f32.mrb[17].mxu0 }
 0x280 PF: > { %s18_s26 = sadd.s32 1, %s1218_s26   ;;  %s1416_s24 = smov %s1214_s25 }
 0x281   : > { %p15_p5 = scmp.ge.s32.totalorder %s18_s26, 6   ;;  %s1417_s25 = smov %s1419_s27 }
 0x283   :  { %17 = sbr.rel (!%p15_p5) target bundleno = 2 (0x2), region = 100 }

</bundles_post_ra>
